<compile_context>
chip_gen: v6e
topology: v6e:2x2x1
jax: 0.10.0
libtpu: 0.0.40
codegen_flags: <defaults>
</compile_context>

<pallas_src>
import functools

import jax
import jax.numpy as jnp
from jax.experimental import pallas as pl
from jax.experimental.pallas import tpu as pltpu

# ----- config (small, self-consistent synthetic BERT) -----
VOCAB = 50
MAX_POS = 16
HIDDEN = 32
N_HEADS = 4
HEAD_DIM = HIDDEN // N_HEADS
N_LAYERS = 2
INTER = 64
N_LABELS = 3
LN_EPS = 1e-12
ATTN_SCALE = 1.0 / float(HEAD_DIM) ** 0.5


def _gelu(x):
    # tanh-approx GELU (BERT's erf GELU differs negligibly at these scales), kept in f32
    return 0.5 * x * (1.0 + jnp.tanh(0.7978845608028654 * (x + 0.044715 * x * x * x)))


def _layernorm(y, g, b):
    mu = jnp.mean(y, axis=-1, keepdims=True)
    var = jnp.mean((y - mu) ** 2, axis=-1, keepdims=True)
    return (y - mu) * jax.lax.rsqrt(var + LN_EPS) * g + b


# =========================== single fused Pallas kernel ===========================

def bert_fused_kernel(emb_ref, bias_ref,
                      emb_ln_g_ref, emb_ln_b_ref,
                      q_w_ref, q_b_ref, k_w_ref, k_b_ref, v_w_ref, v_b_ref,
                      o_w_ref, o_b_ref,
                      ln1_g_ref, ln1_b_ref,
                      ffn1_w_ref, ffn1_b_ref, ffn2_w_ref, ffn2_b_ref,
                      ln2_g_ref, ln2_b_ref,
                      pool_w_ref, pool_b_ref, cls_w_ref, cls_b_ref,
                      out_ref, *, batch, seq):
    bs = batch * seq

    # ----- embedding layernorm (no residual / no zero tensor) -----
    x = _layernorm(emb_ref[...], emb_ln_g_ref[...], emb_ln_b_ref[...])     # (bs, H)

    # additive attention bias over flattened rows: 0 where a query row may attend a key,
    # -1e9 for padded keys or keys of a different batch element (batch-block-diagonal)
    bias = bias_ref[...]                                                   # (bs, bs)

    # per-head lane masks built once from iota: head split via VPU multiply instead of
    # narrow 8-lane slices (which would relayout through the XLU)
    lane = jax.lax.broadcasted_iota(jnp.int32, (1, HIDDEN), 1)
    head_masks = [((lane >= h * HEAD_DIM) & (lane < (h + 1) * HEAD_DIM)).astype(jnp.float32)
                  for h in range(N_HEADS)]

    for l in range(N_LAYERS):
        # ----- Q/K/V projections (full 32-lane width, no value slicing) -----
        q = jnp.dot(x, q_w_ref[l], preferred_element_type=jnp.float32) + q_b_ref[l]
        k = jnp.dot(x, k_w_ref[l], preferred_element_type=jnp.float32) + k_b_ref[l]
        v = jnp.dot(x, v_w_ref[l], preferred_element_type=jnp.float32) + v_b_ref[l]
        q = q * ATTN_SCALE                                                 # once per layer
        o_w = o_w_ref[l]                                                   # (H, H)

        # ----- per-head attention; output projection folded into the head loop -----
        attn = jnp.zeros((bs, HIDDEN), jnp.float32)
        for h in range(N_HEADS):
            m = head_masks[h]
            qh = q * m                                                     # zero outside head lanes
            s = jax.lax.dot_general(qh, k, (((1,), (1,)), ((), ())),
                                    preferred_element_type=jnp.float32)    # (bs, bs)
            s = s + bias
            s = s - jnp.max(s, axis=-1, keepdims=True)
            p = jnp.exp(s)
            p = p * pl.reciprocal(jnp.sum(p, axis=-1, keepdims=True), approx=True)
            # context has zeros outside the head's lanes -> ctx @ o_w picks the head's rows
            ctx = jnp.dot(p, v * m, preferred_element_type=jnp.float32)    # (bs, H)
            attn = attn + jnp.dot(ctx, o_w, preferred_element_type=jnp.float32)
        attn = attn + o_b_ref[l]
        x = _layernorm(attn + x, ln1_g_ref[l], ln1_b_ref[l])

        # ----- feed-forward -----
        h1 = _gelu(jnp.dot(x, ffn1_w_ref[l],
                           preferred_element_type=jnp.float32) + ffn1_b_ref[l])   # (bs, INTER)
        h2 = jnp.dot(h1, ffn2_w_ref[l],
                     preferred_element_type=jnp.float32) + ffn2_b_ref[l]          # (bs, H)
        x = _layernorm(h2 + x, ln2_g_ref[l], ln2_b_ref[l])

    # ----- fused pooler (tanh) + classifier + log-softmax tail -----
    # CLS-row gather as a tiny selection matmul (MXU) instead of sublane concat/gather
    row = jax.lax.broadcasted_iota(jnp.int32, (batch, bs), 0)
    col = jax.lax.broadcasted_iota(jnp.int32, (batch, bs), 1)
    sel = (col == row * seq).astype(jnp.float32)                           # (B, bs)
    cls_x = jnp.dot(sel, x, preferred_element_type=jnp.float32)            # (B, H)

    pooled = jnp.tanh(jnp.dot(cls_x, pool_w_ref[...],
                              preferred_element_type=jnp.float32) + pool_b_ref[...])
    logits = jnp.dot(pooled, cls_w_ref[...],
                     preferred_element_type=jnp.float32) + cls_b_ref[...]  # (B, N_LABELS)
    shifted = logits - jnp.max(logits, axis=-1, keepdims=True)
    lse = jnp.log(jnp.sum(jnp.exp(shifted), axis=-1, keepdims=True))
    out_ref[...] = shifted - lse                                           # LogSoftmax(dim=1)


# =========================== parameters ===========================

def init_params(key):
    ks = iter(jax.random.split(key, 64))

    def nrm(shape):
        return 0.02 * jax.random.normal(next(ks), shape, jnp.float32)

    return {
        "word_emb": nrm((VOCAB, HIDDEN)),
        "pos_emb": nrm((MAX_POS, HIDDEN)),
        "type_emb": nrm((2, HIDDEN)),
        "emb_ln_g": jnp.ones((1, HIDDEN), jnp.float32),
        "emb_ln_b": jnp.zeros((1, HIDDEN), jnp.float32),
        # per-layer weights stacked along a leading layer axis
        "q_w": nrm((N_LAYERS, HIDDEN, HIDDEN)),
        "q_b": jnp.zeros((N_LAYERS, 1, HIDDEN), jnp.float32),
        "k_w": nrm((N_LAYERS, HIDDEN, HIDDEN)),
        "k_b": jnp.zeros((N_LAYERS, 1, HIDDEN), jnp.float32),
        "v_w": nrm((N_LAYERS, HIDDEN, HIDDEN)),
        "v_b": jnp.zeros((N_LAYERS, 1, HIDDEN), jnp.float32),
        "o_w": nrm((N_LAYERS, HIDDEN, HIDDEN)),
        "o_b": jnp.zeros((N_LAYERS, 1, HIDDEN), jnp.float32),
        "ln1_g": jnp.ones((N_LAYERS, 1, HIDDEN), jnp.float32),
        "ln1_b": jnp.zeros((N_LAYERS, 1, HIDDEN), jnp.float32),
        "ffn1_w": nrm((N_LAYERS, HIDDEN, INTER)),
        "ffn1_b": jnp.zeros((N_LAYERS, 1, INTER), jnp.float32),
        "ffn2_w": nrm((N_LAYERS, INTER, HIDDEN)),
        "ffn2_b": jnp.zeros((N_LAYERS, 1, HIDDEN), jnp.float32),
        "ln2_g": jnp.ones((N_LAYERS, 1, HIDDEN), jnp.float32),
        "ln2_b": jnp.zeros((N_LAYERS, 1, HIDDEN), jnp.float32),
        "pool_w": nrm((HIDDEN, HIDDEN)),
        "pool_b": jnp.zeros((1, HIDDEN), jnp.float32),
        "cls_w": nrm((HIDDEN, N_LABELS)),
        "cls_b": jnp.zeros((1, N_LABELS), jnp.float32),
    }


# =========================== shared preprocessing ===========================

def _embed_and_bias(params, input_ids, attention_mask):
    B, S = input_ids.shape
    # TODO(synk): token-id embedding gather stays in plain JAX (data-dependent row gather;
    # a Pallas version would need manual DMA gather which is overkill at this size).
    word = jnp.take(params["word_emb"], input_ids, axis=0)                 # (B, S, H)
    pos = params["pos_emb"][:S][None, :, :]                                # (1, S, H)
    typ = params["type_emb"][0][None, None, :]                             # (1, 1, H)
    emb = (word + pos + typ).reshape(B * S, HIDDEN).astype(jnp.float32)

    # flattened additive attention bias (HF-style)
    batch_ids = jnp.repeat(jnp.arange(B, dtype=jnp.int32), S)
    key_valid = attention_mask.reshape(-1) > 0
    allowed = (batch_ids[:, None] == batch_ids[None, :]) & key_valid[None, :]
    bias = jnp.where(allowed, 0.0, -1e9).astype(jnp.float32)               # (B*S, B*S)
    return emb, bias


# =========================== forward (== BERT_Arch.forward) ===========================

def bert_arch_forward(params, input_ids, attention_mask):
    B, S = input_ids.shape
    emb, bias = _embed_and_bias(params, input_ids, attention_mask)

    kernel = functools.partial(bert_fused_kernel, batch=B, seq=S)
    return pl.pallas_call(
        kernel,
        out_shape=jax.ShapeDtypeStruct((B, N_LABELS), jnp.float32),
        compiler_params=pltpu.CompilerParams(vmem_limit_bytes=32 * 1024 * 1024),
    )(emb, bias,
      params["emb_ln_g"], params["emb_ln_b"],
      params["q_w"], params["q_b"], params["k_w"], params["k_b"],
      params["v_w"], params["v_b"], params["o_w"], params["o_b"],
      params["ln1_g"], params["ln1_b"],
      params["ffn1_w"], params["ffn1_b"], params["ffn2_w"], params["ffn2_b"],
      params["ln2_g"], params["ln2_b"],
      params["pool_w"], params["pool_b"], params["cls_w"], params["cls_b"])


# =========================== pure-JAX reference ===========================

def bert_arch_reference(params, input_ids, attention_mask):
    B, S = input_ids.shape
    emb, bias = _embed_and_bias(params, input_ids, attention_mask)
    x = _layernorm(emb, params["emb_ln_g"], params["emb_ln_b"])

    for l in range(N_LAYERS):
        q = x @ params["q_w"][l] + params["q_b"][l]
        k = x @ params["k_w"][l] + params["k_b"][l]
        v = x @ params["v_w"][l] + params["v_b"][l]
        attn = jnp.zeros_like(x)
        for h in range(N_HEADS):
            lo = h * HEAD_DIM
            qh = q[:, lo:lo + HEAD_DIM]
            kh = k[:, lo:lo + HEAD_DIM]
            vh = v[:, lo:lo + HEAD_DIM]
            s = (qh @ kh.T) * ATTN_SCALE + bias
            p = jax.nn.softmax(s, axis=-1)
            attn = attn + (p @ vh) @ params["o_w"][l][lo:lo + HEAD_DIM, :]
        attn = attn + params["o_b"][l]
        x = _layernorm(attn + x, params["ln1_g"][l], params["ln1_b"][l])

        h1 = _gelu(x @ params["ffn1_w"][l] + params["ffn1_b"][l])
        h2 = h1 @ params["ffn2_w"][l] + params["ffn2_b"][l]
        x = _layernorm(h2 + x, params["ln2_g"][l], params["ln2_b"][l])

    cls_x = x.reshape(B, S, HIDDEN)[:, 0, :]
    pooled = jnp.tanh(cls_x @ params["pool_w"] + params["pool_b"])
    logits = pooled @ params["cls_w"] + params["cls_b"]
    return jax.nn.log_softmax(logits, axis=-1)


if __name__ == "__main__":
    key = jax.random.PRNGKey(0)
    pkey, dkey = jax.random.split(key)
    params = init_params(pkey)

    B, S = 2, 8
    input_ids = jax.random.randint(dkey, (B, S), 0, VOCAB, dtype=jnp.int32)
    attention_mask = jnp.array([[1, 1, 1, 1, 1, 1, 1, 1],
                                [1, 1, 1, 1, 1, 0, 0, 0]], dtype=jnp.int32)

    out = jax.jit(bert_arch_forward)(params, input_ids, attention_mask)
    out = jax.block_until_ready(out)
    ref = bert_arch_reference(params, input_ids, attention_mask)

    assert out.shape == (B, N_LABELS)
    assert out.dtype == jnp.float32
    # log-softmax rows must exp-sum to 1
    assert bool(jnp.all(jnp.abs(jnp.sum(jnp.exp(out), axis=1) - 1.0) < 1e-4))
    # match the pure-JAX reference (slack for approx reciprocal on the EUP)
    assert bool(jnp.max(jnp.abs(out - ref)) < 5e-3)
    print("KERNEL_OK")
</pallas_src>

<mosaic_0001>
module attributes {stable_mosaic.version = 11 : i64} {
  func.func @bert_fused_kernel(%arg0: memref<16x32xf32, #tpu.memory_space<vmem>>, %arg1: memref<16x16xf32, #tpu.memory_space<vmem>>, %arg2: memref<1x32xf32, #tpu.memory_space<vmem>>, %arg3: memref<1x32xf32, #tpu.memory_space<vmem>>, %arg4: memref<2x32x32xf32, #tpu.memory_space<vmem>>, %arg5: memref<2x1x32xf32, #tpu.memory_space<vmem>>, %arg6: memref<2x32x32xf32, #tpu.memory_space<vmem>>, %arg7: memref<2x1x32xf32, #tpu.memory_space<vmem>>, %arg8: memref<2x32x32xf32, #tpu.memory_space<vmem>>, %arg9: memref<2x1x32xf32, #tpu.memory_space<vmem>>, %arg10: memref<2x32x32xf32, #tpu.memory_space<vmem>>, %arg11: memref<2x1x32xf32, #tpu.memory_space<vmem>>, %arg12: memref<2x1x32xf32, #tpu.memory_space<vmem>>, %arg13: memref<2x1x32xf32, #tpu.memory_space<vmem>>, %arg14: memref<2x32x64xf32, #tpu.memory_space<vmem>>, %arg15: memref<2x1x64xf32, #tpu.memory_space<vmem>>, %arg16: memref<2x64x32xf32, #tpu.memory_space<vmem>>, %arg17: memref<2x1x32xf32, #tpu.memory_space<vmem>>, %arg18: memref<2x1x32xf32, #tpu.memory_space<vmem>>, %arg19: memref<2x1x32xf32, #tpu.memory_space<vmem>>, %arg20: memref<32x32xf32, #tpu.memory_space<vmem>>, %arg21: memref<1x32xf32, #tpu.memory_space<vmem>>, %arg22: memref<32x3xf32, #tpu.memory_space<vmem>>, %arg23: memref<1x3xf32, #tpu.memory_space<vmem>>, %arg24: memref<2x3xf32, #tpu.memory_space<vmem>>) attributes {dimension_semantics = [], scalar_prefetch = 0 : i64, scratch_operands = 0 : i64, tpu.core_type = #tpu.core_type<tc>} {
    %c0 = arith.constant 0 : index
    %c0_0 = arith.constant 0 : index
    %0 = vector.load %arg0[%c0, %c0_0] : memref<16x32xf32, #tpu.memory_space<vmem>>, vector<16x32xf32>
    %c0_1 = arith.constant 0 : index
    %c0_2 = arith.constant 0 : index
    %1 = vector.load %arg2[%c0_1, %c0_2] : memref<1x32xf32, #tpu.memory_space<vmem>>, vector<1x32xf32>
    %c0_3 = arith.constant 0 : index
    %c0_4 = arith.constant 0 : index
    %2 = vector.load %arg3[%c0_3, %c0_4] : memref<1x32xf32, #tpu.memory_space<vmem>>, vector<1x32xf32>
    %cst = arith.constant dense<0.000000e+00> : vector<16xf32>
    %3 = vector.multi_reduction <add>, %0, %cst [1] : vector<16x32xf32> to vector<16xf32>
    %4 = vector.shape_cast %3 : vector<16xf32> to vector<16x1xf32>
    %cst_5 = arith.constant 3.200000e+01 : f32
    %5 = vector.broadcast %cst_5 : f32 to vector<16x1xf32>
    %6 = arith.divf %4, %5 : vector<16x1xf32>
    %7 = vector.broadcast %6 : vector<16x1xf32> to vector<16x32xf32>
    %8 = arith.subf %0, %7 : vector<16x32xf32>
    %9 = arith.mulf %8, %8 : vector<16x32xf32>
    %cst_6 = arith.constant dense<0.000000e+00> : vector<16xf32>
    %10 = vector.multi_reduction <add>, %9, %cst_6 [1] : vector<16x32xf32> to vector<16xf32>
    %11 = vector.shape_cast %10 : vector<16xf32> to vector<16x1xf32>
    %cst_7 = arith.constant 3.200000e+01 : f32
    %12 = vector.broadcast %cst_7 : f32 to vector<16x1xf32>
    %13 = arith.divf %11, %12 : vector<16x1xf32>
    %14 = vector.broadcast %6 : vector<16x1xf32> to vector<16x32xf32>
    %15 = arith.subf %0, %14 : vector<16x32xf32>
    %cst_8 = arith.constant 9.99999996E-13 : f32
    %16 = vector.broadcast %cst_8 : f32 to vector<16x1xf32>
    %17 = arith.addf %13, %16 : vector<16x1xf32>
    %18 = math.rsqrt %17 : vector<16x1xf32>
    %19 = vector.broadcast %18 : vector<16x1xf32> to vector<16x32xf32>
    %20 = arith.mulf %15, %19 : vector<16x32xf32>
    %21 = vector.broadcast %1 : vector<1x32xf32> to vector<16x32xf32>
    %22 = arith.mulf %20, %21 : vector<16x32xf32>
    %23 = vector.broadcast %2 : vector<1x32xf32> to vector<16x32xf32>
    %24 = arith.addf %22, %23 : vector<16x32xf32>
    %c0_9 = arith.constant 0 : index
    %c0_10 = arith.constant 0 : index
    %25 = vector.load %arg1[%c0_9, %c0_10] : memref<16x16xf32, #tpu.memory_space<vmem>>, vector<16x16xf32>
    %26 = tpu.iota {dimensions = array<i32: 1>} : vector<1x32xi32>
    %c0_i32 = arith.constant 0 : i32
    %27 = vector.broadcast %c0_i32 : i32 to vector<1x32xi32>
    %28 = arith.cmpi sge, %26, %27 : vector<1x32xi32>
    %c8_i32 = arith.constant 8 : i32
    %29 = vector.broadcast %c8_i32 : i32 to vector<1x32xi32>
    %30 = arith.cmpi slt, %26, %29 : vector<1x32xi32>
    %31 = arith.andi %28, %30 : vector<1x32xi1>
    %32 = arith.extui %31 : vector<1x32xi1> to vector<1x32xi32>
    %33 = arith.sitofp %32 : vector<1x32xi32> to vector<1x32xf32>
    %c8_i32_11 = arith.constant 8 : i32
    %34 = vector.broadcast %c8_i32_11 : i32 to vector<1x32xi32>
    %35 = arith.cmpi sge, %26, %34 : vector<1x32xi32>
    %c16_i32 = arith.constant 16 : i32
    %36 = vector.broadcast %c16_i32 : i32 to vector<1x32xi32>
    %37 = arith.cmpi slt, %26, %36 : vector<1x32xi32>
    %38 = arith.andi %35, %37 : vector<1x32xi1>
    %39 = arith.extui %38 : vector<1x32xi1> to vector<1x32xi32>
    %40 = arith.sitofp %39 : vector<1x32xi32> to vector<1x32xf32>
    %c16_i32_12 = arith.constant 16 : i32
    %41 = vector.broadcast %c16_i32_12 : i32 to vector<1x32xi32>
    %42 = arith.cmpi sge, %26, %41 : vector<1x32xi32>
    %c24_i32 = arith.constant 24 : i32
    %43 = vector.broadcast %c24_i32 : i32 to vector<1x32xi32>
    %44 = arith.cmpi slt, %26, %43 : vector<1x32xi32>
    %45 = arith.andi %42, %44 : vector<1x32xi1>
    %46 = arith.extui %45 : vector<1x32xi1> to vector<1x32xi32>
    %47 = arith.sitofp %46 : vector<1x32xi32> to vector<1x32xf32>
    %c24_i32_13 = arith.constant 24 : i32
    %48 = vector.broadcast %c24_i32_13 : i32 to vector<1x32xi32>
    %49 = arith.cmpi sge, %26, %48 : vector<1x32xi32>
    %c32_i32 = arith.constant 32 : i32
    %50 = vector.broadcast %c32_i32 : i32 to vector<1x32xi32>
    %51 = arith.cmpi slt, %26, %50 : vector<1x32xi32>
    %52 = arith.andi %49, %51 : vector<1x32xi1>
    %53 = arith.extui %52 : vector<1x32xi1> to vector<1x32xi32>
    %54 = arith.sitofp %53 : vector<1x32xi32> to vector<1x32xf32>
    %c0_14 = arith.constant 0 : index
    %c0_15 = arith.constant 0 : index
    %c0_16 = arith.constant 0 : index
    %55 = vector.load %arg4[%c0_14, %c0_15, %c0_16] : memref<2x32x32xf32, #tpu.memory_space<vmem>>, vector<1x32x32xf32>
    %56 = vector.shape_cast %55 : vector<1x32x32xf32> to vector<32x32xf32>
    %cst_17 = arith.constant dense<0.000000e+00> : vector<16x32xf32>
    %57 = tpu.matmul %24, %56, %cst_17 {dimension_numbers = #tpu.dot_dimension_numbers<[1], [0], [0], [1], [0, 0, 1, 1], [], []>} : vector<16x32xf32>, vector<32x32xf32>, vector<16x32xf32> -> vector<16x32xf32>
    %c0_18 = arith.constant 0 : index
    %c0_19 = arith.constant 0 : index
    %c0_20 = arith.constant 0 : index
    %58 = vector.load %arg5[%c0_18, %c0_19, %c0_20] : memref<2x1x32xf32, #tpu.memory_space<vmem>>, vector<1x1x32xf32>
    %59 = vector.shape_cast %58 : vector<1x1x32xf32> to vector<1x32xf32>
    %60 = vector.broadcast %59 : vector<1x32xf32> to vector<16x32xf32>
    %61 = arith.addf %57, %60 : vector<16x32xf32>
    %c0_21 = arith.constant 0 : index
    %c0_22 = arith.constant 0 : index
    %c0_23 = arith.constant 0 : index
    %62 = vector.load %arg6[%c0_21, %c0_22, %c0_23] : memref<2x32x32xf32, #tpu.memory_space<vmem>>, vector<1x32x32xf32>
    %63 = vector.shape_cast %62 : vector<1x32x32xf32> to vector<32x32xf32>
    %cst_24 = arith.constant dense<0.000000e+00> : vector<16x32xf32>
    %64 = tpu.matmul %24, %63, %cst_24 {dimension_numbers = #tpu.dot_dimension_numbers<[1], [0], [0], [1], [0, 0, 1, 1], [], []>} : vector<16x32xf32>, vector<32x32xf32>, vector<16x32xf32> -> vector<16x32xf32>
    %c0_25 = arith.constant 0 : index
    %c0_26 = arith.constant 0 : index
    %c0_27 = arith.constant 0 : index
    %65 = vector.load %arg7[%c0_25, %c0_26, %c0_27] : memref<2x1x32xf32, #tpu.memory_space<vmem>>, vector<1x1x32xf32>
    %66 = vector.shape_cast %65 : vector<1x1x32xf32> to vector<1x32xf32>
    %67 = vector.broadcast %66 : vector<1x32xf32> to vector<16x32xf32>
    %68 = arith.addf %64, %67 : vector<16x32xf32>
    %c0_28 = arith.constant 0 : index
    %c0_29 = arith.constant 0 : index
    %c0_30 = arith.constant 0 : index
    %69 = vector.load %arg8[%c0_28, %c0_29, %c0_30] : memref<2x32x32xf32, #tpu.memory_space<vmem>>, vector<1x32x32xf32>
    %70 = vector.shape_cast %69 : vector<1x32x32xf32> to vector<32x32xf32>
    %cst_31 = arith.constant dense<0.000000e+00> : vector<16x32xf32>
    %71 = tpu.matmul %24, %70, %cst_31 {dimension_numbers = #tpu.dot_dimension_numbers<[1], [0], [0], [1], [0, 0, 1, 1], [], []>} : vector<16x32xf32>, vector<32x32xf32>, vector<16x32xf32> -> vector<16x32xf32>
    %c0_32 = arith.constant 0 : index
    %c0_33 = arith.constant 0 : index
    %c0_34 = arith.constant 0 : index
    %72 = vector.load %arg9[%c0_32, %c0_33, %c0_34] : memref<2x1x32xf32, #tpu.memory_space<vmem>>, vector<1x1x32xf32>
    %73 = vector.shape_cast %72 : vector<1x1x32xf32> to vector<1x32xf32>
    %74 = vector.broadcast %73 : vector<1x32xf32> to vector<16x32xf32>
    %75 = arith.addf %71, %74 : vector<16x32xf32>
    %cst_35 = arith.constant 0.353553385 : f32
    %76 = vector.broadcast %cst_35 : f32 to vector<16x32xf32>
    %77 = arith.mulf %61, %76 : vector<16x32xf32>
    %c0_36 = arith.constant 0 : index
    %c0_37 = arith.constant 0 : index
    %c0_38 = arith.constant 0 : index
    %78 = vector.load %arg10[%c0_36, %c0_37, %c0_38] : memref<2x32x32xf32, #tpu.memory_space<vmem>>, vector<1x32x32xf32>
    %79 = vector.shape_cast %78 : vector<1x32x32xf32> to vector<32x32xf32>
    %cst_39 = arith.constant 0.000000e+00 : f32
    %80 = vector.broadcast %cst_39 : f32 to vector<16x32xf32>
    %81 = vector.broadcast %33 : vector<1x32xf32> to vector<16x32xf32>
    %82 = arith.mulf %77, %81 : vector<16x32xf32>
    %cst_40 = arith.constant dense<0.000000e+00> : vector<16x16xf32>
    %83 = tpu.matmul %82, %68, %cst_40 {dimension_numbers = #tpu.dot_dimension_numbers<[1], [1], [0], [0], [0, 0, 1, 0], [], []>} : vector<16x32xf32>, vector<16x32xf32>, vector<16x16xf32> -> vector<16x16xf32>
    %84 = arith.addf %83, %25 : vector<16x16xf32>
    %cst_41 = arith.constant dense<0xFF800000> : vector<16xf32>
    %85 = vector.multi_reduction <maximumf>, %84, %cst_41 [1] : vector<16x16xf32> to vector<16xf32>
    %86 = vector.shape_cast %85 : vector<16xf32> to vector<16x1xf32>
    %87 = vector.broadcast %86 : vector<16x1xf32> to vector<16x16xf32>
    %88 = arith.subf %84, %87 : vector<16x16xf32>
    %89 = math.exp %88 : vector<16x16xf32>
    %cst_42 = arith.constant dense<0.000000e+00> : vector<16xf32>
    %90 = vector.multi_reduction <add>, %89, %cst_42 [1] : vector<16x16xf32> to vector<16xf32>
    %91 = vector.shape_cast %90 : vector<16xf32> to vector<16x1xf32>
    %92 = tpu.reciprocal %91 {approx = true} : vector<16x1xf32> -> vector<16x1xf32>
    %93 = vector.broadcast %92 : vector<16x1xf32> to vector<16x16xf32>
    %94 = arith.mulf %89, %93 : vector<16x16xf32>
    %95 = vector.broadcast %33 : vector<1x32xf32> to vector<16x32xf32>
    %96 = arith.mulf %75, %95 : vector<16x32xf32>
    %cst_43 = arith.constant dense<0.000000e+00> : vector<16x32xf32>
    %97 = tpu.matmul %94, %96, %cst_43 {dimension_numbers = #tpu.dot_dimension_numbers<[1], [0], [0], [1], [0, 0, 1, 1], [], []>} : vector<16x16xf32>, vector<16x32xf32>, vector<16x32xf32> -> vector<16x32xf32>
    %cst_44 = arith.constant dense<0.000000e+00> : vector<16x32xf32>
    %98 = tpu.matmul %97, %79, %cst_44 {dimension_numbers = #tpu.dot_dimension_numbers<[1], [0], [0], [1], [0, 0, 1, 1], [], []>} : vector<16x32xf32>, vector<32x32xf32>, vector<16x32xf32> -> vector<16x32xf32>
    %99 = arith.addf %80, %98 : vector<16x32xf32>
    %100 = vector.broadcast %40 : vector<1x32xf32> to vector<16x32xf32>
    %101 = arith.mulf %77, %100 : vector<16x32xf32>
    %cst_45 = arith.constant dense<0.000000e+00> : vector<16x16xf32>
    %102 = tpu.matmul %101, %68, %cst_45 {dimension_numbers = #tpu.dot_dimension_numbers<[1], [1], [0], [0], [0, 0, 1, 0], [], []>} : vector<16x32xf32>, vector<16x32xf32>, vector<16x16xf32> -> vector<16x16xf32>
    %103 = arith.addf %102, %25 : vector<16x16xf32>
    %cst_46 = arith.constant dense<0xFF800000> : vector<16xf32>
    %104 = vector.multi_reduction <maximumf>, %103, %cst_46 [1] : vector<16x16xf32> to vector<16xf32>
    %105 = vector.shape_cast %104 : vector<16xf32> to vector<16x1xf32>
    %106 = vector.broadcast %105 : vector<16x1xf32> to vector<16x16xf32>
    %107 = arith.subf %103, %106 : vector<16x16xf32>
    %108 = math.exp %107 : vector<16x16xf32>
    %cst_47 = arith.constant dense<0.000000e+00> : vector<16xf32>
    %109 = vector.multi_reduction <add>, %108, %cst_47 [1] : vector<16x16xf32> to vector<16xf32>
    %110 = vector.shape_cast %109 : vector<16xf32> to vector<16x1xf32>
    %111 = tpu.reciprocal %110 {approx = true} : vector<16x1xf32> -> vector<16x1xf32>
    %112 = vector.broadcast %111 : vector<16x1xf32> to vector<16x16xf32>
    %113 = arith.mulf %108, %112 : vector<16x16xf32>
    %114 = vector.broadcast %40 : vector<1x32xf32> to vector<16x32xf32>
    %115 = arith.mulf %75, %114 : vector<16x32xf32>
    %cst_48 = arith.constant dense<0.000000e+00> : vector<16x32xf32>
    %116 = tpu.matmul %113, %115, %cst_48 {dimension_numbers = #tpu.dot_dimension_numbers<[1], [0], [0], [1], [0, 0, 1, 1], [], []>} : vector<16x16xf32>, vector<16x32xf32>, vector<16x32xf32> -> vector<16x32xf32>
    %cst_49 = arith.constant dense<0.000000e+00> : vector<16x32xf32>
    %117 = tpu.matmul %116, %79, %cst_49 {dimension_numbers = #tpu.dot_dimension_numbers<[1], [0], [0], [1], [0, 0, 1, 1], [], []>} : vector<16x32xf32>, vector<32x32xf32>, vector<16x32xf32> -> vector<16x32xf32>
    %118 = arith.addf %99, %117 : vector<16x32xf32>
    %119 = vector.broadcast %47 : vector<1x32xf32> to vector<16x32xf32>
    %120 = arith.mulf %77, %119 : vector<16x32xf32>
    %cst_50 = arith.constant dense<0.000000e+00> : vector<16x16xf32>
    %121 = tpu.matmul %120, %68, %cst_50 {dimension_numbers = #tpu.dot_dimension_numbers<[1], [1], [0], [0], [0, 0, 1, 0], [], []>} : vector<16x32xf32>, vector<16x32xf32>, vector<16x16xf32> -> vector<16x16xf32>
    %122 = arith.addf %121, %25 : vector<16x16xf32>
    %cst_51 = arith.constant dense<0xFF800000> : vector<16xf32>
    %123 = vector.multi_reduction <maximumf>, %122, %cst_51 [1] : vector<16x16xf32> to vector<16xf32>
    %124 = vector.shape_cast %123 : vector<16xf32> to vector<16x1xf32>
    %125 = vector.broadcast %124 : vector<16x1xf32> to vector<16x16xf32>
    %126 = arith.subf %122, %125 : vector<16x16xf32>
    %127 = math.exp %126 : vector<16x16xf32>
    %cst_52 = arith.constant dense<0.000000e+00> : vector<16xf32>
    %128 = vector.multi_reduction <add>, %127, %cst_52 [1] : vector<16x16xf32> to vector<16xf32>
    %129 = vector.shape_cast %128 : vector<16xf32> to vector<16x1xf32>
    %130 = tpu.reciprocal %129 {approx = true} : vector<16x1xf32> -> vector<16x1xf32>
    %131 = vector.broadcast %130 : vector<16x1xf32> to vector<16x16xf32>
    %132 = arith.mulf %127, %131 : vector<16x16xf32>
    %133 = vector.broadcast %47 : vector<1x32xf32> to vector<16x32xf32>
    %134 = arith.mulf %75, %133 : vector<16x32xf32>
    %cst_53 = arith.constant dense<0.000000e+00> : vector<16x32xf32>
    %135 = tpu.matmul %132, %134, %cst_53 {dimension_numbers = #tpu.dot_dimension_numbers<[1], [0], [0], [1], [0, 0, 1, 1], [], []>} : vector<16x16xf32>, vector<16x32xf32>, vector<16x32xf32> -> vector<16x32xf32>
    %cst_54 = arith.constant dense<0.000000e+00> : vector<16x32xf32>
    %136 = tpu.matmul %135, %79, %cst_54 {dimension_numbers = #tpu.dot_dimension_numbers<[1], [0], [0], [1], [0, 0, 1, 1], [], []>} : vector<16x32xf32>, vector<32x32xf32>, vector<16x32xf32> -> vector<16x32xf32>
    %137 = arith.addf %118, %136 : vector<16x32xf32>
    %138 = vector.broadcast %54 : vector<1x32xf32> to vector<16x32xf32>
    %139 = arith.mulf %77, %138 : vector<16x32xf32>
    %cst_55 = arith.constant dense<0.000000e+00> : vector<16x16xf32>
    %140 = tpu.matmul %139, %68, %cst_55 {dimension_numbers = #tpu.dot_dimension_numbers<[1], [1], [0], [0], [0, 0, 1, 0], [], []>} : vector<16x32xf32>, vector<16x32xf32>, vector<16x16xf32> -> vector<16x16xf32>
    %141 = arith.addf %140, %25 : vector<16x16xf32>
    %cst_56 = arith.constant dense<0xFF800000> : vector<16xf32>
    %142 = vector.multi_reduction <maximumf>, %141, %cst_56 [1] : vector<16x16xf32> to vector<16xf32>
    %143 = vector.shape_cast %142 : vector<16xf32> to vector<16x1xf32>
    %144 = vector.broadcast %143 : vector<16x1xf32> to vector<16x16xf32>
    %145 = arith.subf %141, %144 : vector<16x16xf32>
    %146 = math.exp %145 : vector<16x16xf32>
    %cst_57 = arith.constant dense<0.000000e+00> : vector<16xf32>
    %147 = vector.multi_reduction <add>, %146, %cst_57 [1] : vector<16x16xf32> to vector<16xf32>
    %148 = vector.shape_cast %147 : vector<16xf32> to vector<16x1xf32>
    %149 = tpu.reciprocal %148 {approx = true} : vector<16x1xf32> -> vector<16x1xf32>
    %150 = vector.broadcast %149 : vector<16x1xf32> to vector<16x16xf32>
    %151 = arith.mulf %146, %150 : vector<16x16xf32>
    %152 = vector.broadcast %54 : vector<1x32xf32> to vector<16x32xf32>
    %153 = arith.mulf %75, %152 : vector<16x32xf32>
    %cst_58 = arith.constant dense<0.000000e+00> : vector<16x32xf32>
    %154 = tpu.matmul %151, %153, %cst_58 {dimension_numbers = #tpu.dot_dimension_numbers<[1], [0], [0], [1], [0, 0, 1, 1], [], []>} : vector<16x16xf32>, vector<16x32xf32>, vector<16x32xf32> -> vector<16x32xf32>
    %cst_59 = arith.constant dense<0.000000e+00> : vector<16x32xf32>
    %155 = tpu.matmul %154, %79, %cst_59 {dimension_numbers = #tpu.dot_dimension_numbers<[1], [0], [0], [1], [0, 0, 1, 1], [], []>} : vector<16x32xf32>, vector<32x32xf32>, vector<16x32xf32> -> vector<16x32xf32>
    %156 = arith.addf %137, %155 : vector<16x32xf32>
    %c0_60 = arith.constant 0 : index
    %c0_61 = arith.constant 0 : index
    %c0_62 = arith.constant 0 : index
    %157 = vector.load %arg11[%c0_60, %c0_61, %c0_62] : memref<2x1x32xf32, #tpu.memory_space<vmem>>, vector<1x1x32xf32>
    %158 = vector.shape_cast %157 : vector<1x1x32xf32> to vector<1x32xf32>
    %159 = vector.broadcast %158 : vector<1x32xf32> to vector<16x32xf32>
    %160 = arith.addf %156, %159 : vector<16x32xf32>
    %161 = arith.addf %160, %24 : vector<16x32xf32>
    %c0_63 = arith.constant 0 : index
    %c0_64 = arith.constant 0 : index
    %c0_65 = arith.constant 0 : index
    %162 = vector.load %arg12[%c0_63, %c0_64, %c0_65] : memref<2x1x32xf32, #tpu.memory_space<vmem>>, vector<1x1x32xf32>
    %163 = vector.shape_cast %162 : vector<1x1x32xf32> to vector<1x32xf32>
    %c0_66 = arith.constant 0 : index
    %c0_67 = arith.constant 0 : index
    %c0_68 = arith.constant 0 : index
    %164 = vector.load %arg13[%c0_66, %c0_67, %c0_68] : memref<2x1x32xf32, #tpu.memory_space<vmem>>, vector<1x1x32xf32>
    %165 = vector.shape_cast %164 : vector<1x1x32xf32> to vector<1x32xf32>
    %cst_69 = arith.constant dense<0.000000e+00> : vector<16xf32>
    %166 = vector.multi_reduction <add>, %161, %cst_69 [1] : vector<16x32xf32> to vector<16xf32>
    %167 = vector.shape_cast %166 : vector<16xf32> to vector<16x1xf32>
    %cst_70 = arith.constant 3.200000e+01 : f32
    %168 = vector.broadcast %cst_70 : f32 to vector<16x1xf32>
    %169 = arith.divf %167, %168 : vector<16x1xf32>
    %170 = vector.broadcast %169 : vector<16x1xf32> to vector<16x32xf32>
    %171 = arith.subf %161, %170 : vector<16x32xf32>
    %172 = arith.mulf %171, %171 : vector<16x32xf32>
    %cst_71 = arith.constant dense<0.000000e+00> : vector<16xf32>
    %173 = vector.multi_reduction <add>, %172, %cst_71 [1] : vector<16x32xf32> to vector<16xf32>
    %174 = vector.shape_cast %173 : vector<16xf32> to vector<16x1xf32>
    %cst_72 = arith.constant 3.200000e+01 : f32
    %175 = vector.broadcast %cst_72 : f32 to vector<16x1xf32>
    %176 = arith.divf %174, %175 : vector<16x1xf32>
    %177 = vector.broadcast %169 : vector<16x1xf32> to vector<16x32xf32>
    %178 = arith.subf %161, %177 : vector<16x32xf32>
    %cst_73 = arith.constant 9.99999996E-13 : f32
    %179 = vector.broadcast %cst_73 : f32 to vector<16x1xf32>
    %180 = arith.addf %176, %179 : vector<16x1xf32>
    %181 = math.rsqrt %180 : vector<16x1xf32>
    %182 = vector.broadcast %181 : vector<16x1xf32> to vector<16x32xf32>
    %183 = arith.mulf %178, %182 : vector<16x32xf32>
    %184 = vector.broadcast %163 : vector<1x32xf32> to vector<16x32xf32>
    %185 = arith.mulf %183, %184 : vector<16x32xf32>
    %186 = vector.broadcast %165 : vector<1x32xf32> to vector<16x32xf32>
    %187 = arith.addf %185, %186 : vector<16x32xf32>
    %c0_74 = arith.constant 0 : index
    %c0_75 = arith.constant 0 : index
    %c0_76 = arith.constant 0 : index
    %188 = vector.load %arg14[%c0_74, %c0_75, %c0_76] : memref<2x32x64xf32, #tpu.memory_space<vmem>>, vector<1x32x64xf32>
    %189 = vector.shape_cast %188 : vector<1x32x64xf32> to vector<32x64xf32>
    %cst_77 = arith.constant dense<0.000000e+00> : vector<16x64xf32>
    %190 = tpu.matmul %187, %189, %cst_77 {dimension_numbers = #tpu.dot_dimension_numbers<[1], [0], [0], [1], [0, 0, 1, 1], [], []>} : vector<16x32xf32>, vector<32x64xf32>, vector<16x64xf32> -> vector<16x64xf32>
    %c0_78 = arith.constant 0 : index
    %c0_79 = arith.constant 0 : index
    %c0_80 = arith.constant 0 : index
    %191 = vector.load %arg15[%c0_78, %c0_79, %c0_80] : memref<2x1x64xf32, #tpu.memory_space<vmem>>, vector<1x1x64xf32>
    %192 = vector.shape_cast %191 : vector<1x1x64xf32> to vector<1x64xf32>
    %193 = vector.broadcast %192 : vector<1x64xf32> to vector<16x64xf32>
    %194 = arith.addf %190, %193 : vector<16x64xf32>
    %cst_81 = arith.constant 5.000000e-01 : f32
    %195 = vector.broadcast %cst_81 : f32 to vector<16x64xf32>
    %196 = arith.mulf %195, %194 : vector<16x64xf32>
    %cst_82 = arith.constant 4.471500e-02 : f32
    %197 = vector.broadcast %cst_82 : f32 to vector<16x64xf32>
    %198 = arith.mulf %197, %194 : vector<16x64xf32>
    %199 = arith.mulf %198, %194 : vector<16x64xf32>
    %200 = arith.mulf %199, %194 : vector<16x64xf32>
    %201 = arith.addf %194, %200 : vector<16x64xf32>
    %cst_83 = arith.constant 0.797884583 : f32
    %202 = vector.broadcast %cst_83 : f32 to vector<16x64xf32>
    %203 = arith.mulf %202, %201 : vector<16x64xf32>
    %204 = math.tanh %203 : vector<16x64xf32>
    %cst_84 = arith.constant 1.000000e+00 : f32
    %205 = vector.broadcast %cst_84 : f32 to vector<16x64xf32>
    %206 = arith.addf %205, %204 : vector<16x64xf32>
    %207 = arith.mulf %196, %206 : vector<16x64xf32>
    %c0_85 = arith.constant 0 : index
    %c0_86 = arith.constant 0 : index
    %c0_87 = arith.constant 0 : index
    %208 = vector.load %arg16[%c0_85, %c0_86, %c0_87] : memref<2x64x32xf32, #tpu.memory_space<vmem>>, vector<1x64x32xf32>
    %209 = vector.shape_cast %208 : vector<1x64x32xf32> to vector<64x32xf32>
    %cst_88 = arith.constant dense<0.000000e+00> : vector<16x32xf32>
    %210 = tpu.matmul %207, %209, %cst_88 {dimension_numbers = #tpu.dot_dimension_numbers<[1], [0], [0], [1], [0, 0, 1, 1], [], []>} : vector<16x64xf32>, vector<64x32xf32>, vector<16x32xf32> -> vector<16x32xf32>
    %c0_89 = arith.constant 0 : index
    %c0_90 = arith.constant 0 : index
    %c0_91 = arith.constant 0 : index
    %211 = vector.load %arg17[%c0_89, %c0_90, %c0_91] : memref<2x1x32xf32, #tpu.memory_space<vmem>>, vector<1x1x32xf32>
    %212 = vector.shape_cast %211 : vector<1x1x32xf32> to vector<1x32xf32>
    %213 = vector.broadcast %212 : vector<1x32xf32> to vector<16x32xf32>
    %214 = arith.addf %210, %213 : vector<16x32xf32>
    %215 = arith.addf %214, %187 : vector<16x32xf32>
    %c0_92 = arith.constant 0 : index
    %c0_93 = arith.constant 0 : index
    %c0_94 = arith.constant 0 : index
    %216 = vector.load %arg18[%c0_92, %c0_93, %c0_94] : memref<2x1x32xf32, #tpu.memory_space<vmem>>, vector<1x1x32xf32>
    %217 = vector.shape_cast %216 : vector<1x1x32xf32> to vector<1x32xf32>
    %c0_95 = arith.constant 0 : index
    %c0_96 = arith.constant 0 : index
    %c0_97 = arith.constant 0 : index
    %218 = vector.load %arg19[%c0_95, %c0_96, %c0_97] : memref<2x1x32xf32, #tpu.memory_space<vmem>>, vector<1x1x32xf32>
    %219 = vector.shape_cast %218 : vector<1x1x32xf32> to vector<1x32xf32>
    %cst_98 = arith.constant dense<0.000000e+00> : vector<16xf32>
    %220 = vector.multi_reduction <add>, %215, %cst_98 [1] : vector<16x32xf32> to vector<16xf32>
    %221 = vector.shape_cast %220 : vector<16xf32> to vector<16x1xf32>
    %cst_99 = arith.constant 3.200000e+01 : f32
    %222 = vector.broadcast %cst_99 : f32 to vector<16x1xf32>
    %223 = arith.divf %221, %222 : vector<16x1xf32>
    %224 = vector.broadcast %223 : vector<16x1xf32> to vector<16x32xf32>
    %225 = arith.subf %215, %224 : vector<16x32xf32>
    %226 = arith.mulf %225, %225 : vector<16x32xf32>
    %cst_100 = arith.constant dense<0.000000e+00> : vector<16xf32>
    %227 = vector.multi_reduction <add>, %226, %cst_100 [1] : vector<16x32xf32> to vector<16xf32>
    %228 = vector.shape_cast %227 : vector<16xf32> to vector<16x1xf32>
    %cst_101 = arith.constant 3.200000e+01 : f32
    %229 = vector.broadcast %cst_101 : f32 to vector<16x1xf32>
    %230 = arith.divf %228, %229 : vector<16x1xf32>
    %231 = vector.broadcast %223 : vector<16x1xf32> to vector<16x32xf32>
    %232 = arith.subf %215, %231 : vector<16x32xf32>
    %cst_102 = arith.constant 9.99999996E-13 : f32
    %233 = vector.broadcast %cst_102 : f32 to vector<16x1xf32>
    %234 = arith.addf %230, %233 : vector<16x1xf32>
    %235 = math.rsqrt %234 : vector<16x1xf32>
    %236 = vector.broadcast %235 : vector<16x1xf32> to vector<16x32xf32>
    %237 = arith.mulf %232, %236 : vector<16x32xf32>
    %238 = vector.broadcast %217 : vector<1x32xf32> to vector<16x32xf32>
    %239 = arith.mulf %237, %238 : vector<16x32xf32>
    %240 = vector.broadcast %219 : vector<1x32xf32> to vector<16x32xf32>
    %241 = arith.addf %239, %240 : vector<16x32xf32>
    %c1 = arith.constant 1 : index
    %c0_103 = arith.constant 0 : index
    %c0_104 = arith.constant 0 : index
    %242 = vector.load %arg4[%c1, %c0_103, %c0_104] : memref<2x32x32xf32, #tpu.memory_space<vmem>>, vector<1x32x32xf32>
    %243 = vector.shape_cast %242 : vector<1x32x32xf32> to vector<32x32xf32>
    %cst_105 = arith.constant dense<0.000000e+00> : vector<16x32xf32>
    %244 = tpu.matmul %241, %243, %cst_105 {dimension_numbers = #tpu.dot_dimension_numbers<[1], [0], [0], [1], [0, 0, 1, 1], [], []>} : vector<16x32xf32>, vector<32x32xf32>, vector<16x32xf32> -> vector<16x32xf32>
    %c1_106 = arith.constant 1 : index
    %c0_107 = arith.constant 0 : index
    %c0_108 = arith.constant 0 : index
    %245 = vector.load %arg5[%c1_106, %c0_107, %c0_108] : memref<2x1x32xf32, #tpu.memory_space<vmem>>, vector<1x1x32xf32>
    %246 = vector.shape_cast %245 : vector<1x1x32xf32> to vector<1x32xf32>
    %247 = vector.broadcast %246 : vector<1x32xf32> to vector<16x32xf32>
    %248 = arith.addf %244, %247 : vector<16x32xf32>
    %c1_109 = arith.constant 1 : index
    %c0_110 = arith.constant 0 : index
    %c0_111 = arith.constant 0 : index
    %249 = vector.load %arg6[%c1_109, %c0_110, %c0_111] : memref<2x32x32xf32, #tpu.memory_space<vmem>>, vector<1x32x32xf32>
    %250 = vector.shape_cast %249 : vector<1x32x32xf32> to vector<32x32xf32>
    %cst_112 = arith.constant dense<0.000000e+00> : vector<16x32xf32>
    %251 = tpu.matmul %241, %250, %cst_112 {dimension_numbers = #tpu.dot_dimension_numbers<[1], [0], [0], [1], [0, 0, 1, 1], [], []>} : vector<16x32xf32>, vector<32x32xf32>, vector<16x32xf32> -> vector<16x32xf32>
    %c1_113 = arith.constant 1 : index
    %c0_114 = arith.constant 0 : index
    %c0_115 = arith.constant 0 : index
    %252 = vector.load %arg7[%c1_113, %c0_114, %c0_115] : memref<2x1x32xf32, #tpu.memory_space<vmem>>, vector<1x1x32xf32>
    %253 = vector.shape_cast %252 : vector<1x1x32xf32> to vector<1x32xf32>
    %254 = vector.broadcast %253 : vector<1x32xf32> to vector<16x32xf32>
    %255 = arith.addf %251, %254 : vector<16x32xf32>
    %c1_116 = arith.constant 1 : index
    %c0_117 = arith.constant 0 : index
    %c0_118 = arith.constant 0 : index
    %256 = vector.load %arg8[%c1_116, %c0_117, %c0_118] : memref<2x32x32xf32, #tpu.memory_space<vmem>>, vector<1x32x32xf32>
    %257 = vector.shape_cast %256 : vector<1x32x32xf32> to vector<32x32xf32>
    %cst_119 = arith.constant dense<0.000000e+00> : vector<16x32xf32>
    %258 = tpu.matmul %241, %257, %cst_119 {dimension_numbers = #tpu.dot_dimension_numbers<[1], [0], [0], [1], [0, 0, 1, 1], [], []>} : vector<16x32xf32>, vector<32x32xf32>, vector<16x32xf32> -> vector<16x32xf32>
    %c1_120 = arith.constant 1 : index
    %c0_121 = arith.constant 0 : index
    %c0_122 = arith.constant 0 : index
    %259 = vector.load %arg9[%c1_120, %c0_121, %c0_122] : memref<2x1x32xf32, #tpu.memory_space<vmem>>, vector<1x1x32xf32>
    %260 = vector.shape_cast %259 : vector<1x1x32xf32> to vector<1x32xf32>
    %261 = vector.broadcast %260 : vector<1x32xf32> to vector<16x32xf32>
    %262 = arith.addf %258, %261 : vector<16x32xf32>
    %cst_123 = arith.constant 0.353553385 : f32
    %263 = vector.broadcast %cst_123 : f32 to vector<16x32xf32>
    %264 = arith.mulf %248, %263 : vector<16x32xf32>
    %c1_124 = arith.constant 1 : index
    %c0_125 = arith.constant 0 : index
    %c0_126 = arith.constant 0 : index
    %265 = vector.load %arg10[%c1_124, %c0_125, %c0_126] : memref<2x32x32xf32, #tpu.memory_space<vmem>>, vector<1x32x32xf32>
    %266 = vector.shape_cast %265 : vector<1x32x32xf32> to vector<32x32xf32>
    %cst_127 = arith.constant 0.000000e+00 : f32
    %267 = vector.broadcast %cst_127 : f32 to vector<16x32xf32>
    %268 = vector.broadcast %33 : vector<1x32xf32> to vector<16x32xf32>
    %269 = arith.mulf %264, %268 : vector<16x32xf32>
    %cst_128 = arith.constant dense<0.000000e+00> : vector<16x16xf32>
    %270 = tpu.matmul %269, %255, %cst_128 {dimension_numbers = #tpu.dot_dimension_numbers<[1], [1], [0], [0], [0, 0, 1, 0], [], []>} : vector<16x32xf32>, vector<16x32xf32>, vector<16x16xf32> -> vector<16x16xf32>
    %271 = arith.addf %270, %25 : vector<16x16xf32>
    %cst_129 = arith.constant dense<0xFF800000> : vector<16xf32>
    %272 = vector.multi_reduction <maximumf>, %271, %cst_129 [1] : vector<16x16xf32> to vector<16xf32>
    %273 = vector.shape_cast %272 : vector<16xf32> to vector<16x1xf32>
    %274 = vector.broadcast %273 : vector<16x1xf32> to vector<16x16xf32>
    %275 = arith.subf %271, %274 : vector<16x16xf32>
    %276 = math.exp %275 : vector<16x16xf32>
    %cst_130 = arith.constant dense<0.000000e+00> : vector<16xf32>
    %277 = vector.multi_reduction <add>, %276, %cst_130 [1] : vector<16x16xf32> to vector<16xf32>
    %278 = vector.shape_cast %277 : vector<16xf32> to vector<16x1xf32>
    %279 = tpu.reciprocal %278 {approx = true} : vector<16x1xf32> -> vector<16x1xf32>
    %280 = vector.broadcast %279 : vector<16x1xf32> to vector<16x16xf32>
    %281 = arith.mulf %276, %280 : vector<16x16xf32>
    %282 = vector.broadcast %33 : vector<1x32xf32> to vector<16x32xf32>
    %283 = arith.mulf %262, %282 : vector<16x32xf32>
    %cst_131 = arith.constant dense<0.000000e+00> : vector<16x32xf32>
    %284 = tpu.matmul %281, %283, %cst_131 {dimension_numbers = #tpu.dot_dimension_numbers<[1], [0], [0], [1], [0, 0, 1, 1], [], []>} : vector<16x16xf32>, vector<16x32xf32>, vector<16x32xf32> -> vector<16x32xf32>
    %cst_132 = arith.constant dense<0.000000e+00> : vector<16x32xf32>
    %285 = tpu.matmul %284, %266, %cst_132 {dimension_numbers = #tpu.dot_dimension_numbers<[1], [0], [0], [1], [0, 0, 1, 1], [], []>} : vector<16x32xf32>, vector<32x32xf32>, vector<16x32xf32> -> vector<16x32xf32>
    %286 = arith.addf %267, %285 : vector<16x32xf32>
    %287 = vector.broadcast %40 : vector<1x32xf32> to vector<16x32xf32>
    %288 = arith.mulf %264, %287 : vector<16x32xf32>
    %cst_133 = arith.constant dense<0.000000e+00> : vector<16x16xf32>
    %289 = tpu.matmul %288, %255, %cst_133 {dimension_numbers = #tpu.dot_dimension_numbers<[1], [1], [0], [0], [0, 0, 1, 0], [], []>} : vector<16x32xf32>, vector<16x32xf32>, vector<16x16xf32> -> vector<16x16xf32>
    %290 = arith.addf %289, %25 : vector<16x16xf32>
    %cst_134 = arith.constant dense<0xFF800000> : vector<16xf32>
    %291 = vector.multi_reduction <maximumf>, %290, %cst_134 [1] : vector<16x16xf32> to vector<16xf32>
    %292 = vector.shape_cast %291 : vector<16xf32> to vector<16x1xf32>
    %293 = vector.broadcast %292 : vector<16x1xf32> to vector<16x16xf32>
    %294 = arith.subf %290, %293 : vector<16x16xf32>
    %295 = math.exp %294 : vector<16x16xf32>
    %cst_135 = arith.constant dense<0.000000e+00> : vector<16xf32>
    %296 = vector.multi_reduction <add>, %295, %cst_135 [1] : vector<16x16xf32> to vector<16xf32>
    %297 = vector.shape_cast %296 : vector<16xf32> to vector<16x1xf32>
    %298 = tpu.reciprocal %297 {approx = true} : vector<16x1xf32> -> vector<16x1xf32>
    %299 = vector.broadcast %298 : vector<16x1xf32> to vector<16x16xf32>
    %300 = arith.mulf %295, %299 : vector<16x16xf32>
    %301 = vector.broadcast %40 : vector<1x32xf32> to vector<16x32xf32>
    %302 = arith.mulf %262, %301 : vector<16x32xf32>
    %cst_136 = arith.constant dense<0.000000e+00> : vector<16x32xf32>
    %303 = tpu.matmul %300, %302, %cst_136 {dimension_numbers = #tpu.dot_dimension_numbers<[1], [0], [0], [1], [0, 0, 1, 1], [], []>} : vector<16x16xf32>, vector<16x32xf32>, vector<16x32xf32> -> vector<16x32xf32>
    %cst_137 = arith.constant dense<0.000000e+00> : vector<16x32xf32>
    %304 = tpu.matmul %303, %266, %cst_137 {dimension_numbers = #tpu.dot_dimension_numbers<[1], [0], [0], [1], [0, 0, 1, 1], [], []>} : vector<16x32xf32>, vector<32x32xf32>, vector<16x32xf32> -> vector<16x32xf32>
    %305 = arith.addf %286, %304 : vector<16x32xf32>
    %306 = vector.broadcast %47 : vector<1x32xf32> to vector<16x32xf32>
    %307 = arith.mulf %264, %306 : vector<16x32xf32>
    %cst_138 = arith.constant dense<0.000000e+00> : vector<16x16xf32>
    %308 = tpu.matmul %307, %255, %cst_138 {dimension_numbers = #tpu.dot_dimension_numbers<[1], [1], [0], [0], [0, 0, 1, 0], [], []>} : vector<16x32xf32>, vector<16x32xf32>, vector<16x16xf32> -> vector<16x16xf32>
    %309 = arith.addf %308, %25 : vector<16x16xf32>
    %cst_139 = arith.constant dense<0xFF800000> : vector<16xf32>
    %310 = vector.multi_reduction <maximumf>, %309, %cst_139 [1] : vector<16x16xf32> to vector<16xf32>
    %311 = vector.shape_cast %310 : vector<16xf32> to vector<16x1xf32>
    %312 = vector.broadcast %311 : vector<16x1xf32> to vector<16x16xf32>
    %313 = arith.subf %309, %312 : vector<16x16xf32>
    %314 = math.exp %313 : vector<16x16xf32>
    %cst_140 = arith.constant dense<0.000000e+00> : vector<16xf32>
    %315 = vector.multi_reduction <add>, %314, %cst_140 [1] : vector<16x16xf32> to vector<16xf32>
    %316 = vector.shape_cast %315 : vector<16xf32> to vector<16x1xf32>
    %317 = tpu.reciprocal %316 {approx = true} : vector<16x1xf32> -> vector<16x1xf32>
    %318 = vector.broadcast %317 : vector<16x1xf32> to vector<16x16xf32>
    %319 = arith.mulf %314, %318 : vector<16x16xf32>
    %320 = vector.broadcast %47 : vector<1x32xf32> to vector<16x32xf32>
    %321 = arith.mulf %262, %320 : vector<16x32xf32>
    %cst_141 = arith.constant dense<0.000000e+00> : vector<16x32xf32>
    %322 = tpu.matmul %319, %321, %cst_141 {dimension_numbers = #tpu.dot_dimension_numbers<[1], [0], [0], [1], [0, 0, 1, 1], [], []>} : vector<16x16xf32>, vector<16x32xf32>, vector<16x32xf32> -> vector<16x32xf32>
    %cst_142 = arith.constant dense<0.000000e+00> : vector<16x32xf32>
    %323 = tpu.matmul %322, %266, %cst_142 {dimension_numbers = #tpu.dot_dimension_numbers<[1], [0], [0], [1], [0, 0, 1, 1], [], []>} : vector<16x32xf32>, vector<32x32xf32>, vector<16x32xf32> -> vector<16x32xf32>
    %324 = arith.addf %305, %323 : vector<16x32xf32>
    %325 = vector.broadcast %54 : vector<1x32xf32> to vector<16x32xf32>
    %326 = arith.mulf %264, %325 : vector<16x32xf32>
    %cst_143 = arith.constant dense<0.000000e+00> : vector<16x16xf32>
    %327 = tpu.matmul %326, %255, %cst_143 {dimension_numbers = #tpu.dot_dimension_numbers<[1], [1], [0], [0], [0, 0, 1, 0], [], []>} : vector<16x32xf32>, vector<16x32xf32>, vector<16x16xf32> -> vector<16x16xf32>
    %328 = arith.addf %327, %25 : vector<16x16xf32>
    %cst_144 = arith.constant dense<0xFF800000> : vector<16xf32>
    %329 = vector.multi_reduction <maximumf>, %328, %cst_144 [1] : vector<16x16xf32> to vector<16xf32>
    %330 = vector.shape_cast %329 : vector<16xf32> to vector<16x1xf32>
    %331 = vector.broadcast %330 : vector<16x1xf32> to vector<16x16xf32>
    %332 = arith.subf %328, %331 : vector<16x16xf32>
    %333 = math.exp %332 : vector<16x16xf32>
    %cst_145 = arith.constant dense<0.000000e+00> : vector<16xf32>
    %334 = vector.multi_reduction <add>, %333, %cst_145 [1] : vector<16x16xf32> to vector<16xf32>
    %335 = vector.shape_cast %334 : vector<16xf32> to vector<16x1xf32>
    %336 = tpu.reciprocal %335 {approx = true} : vector<16x1xf32> -> vector<16x1xf32>
    %337 = vector.broadcast %336 : vector<16x1xf32> to vector<16x16xf32>
    %338 = arith.mulf %333, %337 : vector<16x16xf32>
    %339 = vector.broadcast %54 : vector<1x32xf32> to vector<16x32xf32>
    %340 = arith.mulf %262, %339 : vector<16x32xf32>
    %cst_146 = arith.constant dense<0.000000e+00> : vector<16x32xf32>
    %341 = tpu.matmul %338, %340, %cst_146 {dimension_numbers = #tpu.dot_dimension_numbers<[1], [0], [0], [1], [0, 0, 1, 1], [], []>} : vector<16x16xf32>, vector<16x32xf32>, vector<16x32xf32> -> vector<16x32xf32>
    %cst_147 = arith.constant dense<0.000000e+00> : vector<16x32xf32>
    %342 = tpu.matmul %341, %266, %cst_147 {dimension_numbers = #tpu.dot_dimension_numbers<[1], [0], [0], [1], [0, 0, 1, 1], [], []>} : vector<16x32xf32>, vector<32x32xf32>, vector<16x32xf32> -> vector<16x32xf32>
    %343 = arith.addf %324, %342 : vector<16x32xf32>
    %c1_148 = arith.constant 1 : index
    %c0_149 = arith.constant 0 : index
    %c0_150 = arith.constant 0 : index
    %344 = vector.load %arg11[%c1_148, %c0_149, %c0_150] : memref<2x1x32xf32, #tpu.memory_space<vmem>>, vector<1x1x32xf32>
    %345 = vector.shape_cast %344 : vector<1x1x32xf32> to vector<1x32xf32>
    %346 = vector.broadcast %345 : vector<1x32xf32> to vector<16x32xf32>
    %347 = arith.addf %343, %346 : vector<16x32xf32>
    %348 = arith.addf %347, %241 : vector<16x32xf32>
    %c1_151 = arith.constant 1 : index
    %c0_152 = arith.constant 0 : index
    %c0_153 = arith.constant 0 : index
    %349 = vector.load %arg12[%c1_151, %c0_152, %c0_153] : memref<2x1x32xf32, #tpu.memory_space<vmem>>, vector<1x1x32xf32>
    %350 = vector.shape_cast %349 : vector<1x1x32xf32> to vector<1x32xf32>
    %c1_154 = arith.constant 1 : index
    %c0_155 = arith.constant 0 : index
    %c0_156 = arith.constant 0 : index
    %351 = vector.load %arg13[%c1_154, %c0_155, %c0_156] : memref<2x1x32xf32, #tpu.memory_space<vmem>>, vector<1x1x32xf32>
    %352 = vector.shape_cast %351 : vector<1x1x32xf32> to vector<1x32xf32>
    %cst_157 = arith.constant dense<0.000000e+00> : vector<16xf32>
    %353 = vector.multi_reduction <add>, %348, %cst_157 [1] : vector<16x32xf32> to vector<16xf32>
    %354 = vector.shape_cast %353 : vector<16xf32> to vector<16x1xf32>
    %cst_158 = arith.constant 3.200000e+01 : f32
    %355 = vector.broadcast %cst_158 : f32 to vector<16x1xf32>
    %356 = arith.divf %354, %355 : vector<16x1xf32>
    %357 = vector.broadcast %356 : vector<16x1xf32> to vector<16x32xf32>
    %358 = arith.subf %348, %357 : vector<16x32xf32>
    %359 = arith.mulf %358, %358 : vector<16x32xf32>
    %cst_159 = arith.constant dense<0.000000e+00> : vector<16xf32>
    %360 = vector.multi_reduction <add>, %359, %cst_159 [1] : vector<16x32xf32> to vector<16xf32>
    %361 = vector.shape_cast %360 : vector<16xf32> to vector<16x1xf32>
    %cst_160 = arith.constant 3.200000e+01 : f32
    %362 = vector.broadcast %cst_160 : f32 to vector<16x1xf32>
    %363 = arith.divf %361, %362 : vector<16x1xf32>
    %364 = vector.broadcast %356 : vector<16x1xf32> to vector<16x32xf32>
    %365 = arith.subf %348, %364 : vector<16x32xf32>
    %cst_161 = arith.constant 9.99999996E-13 : f32
    %366 = vector.broadcast %cst_161 : f32 to vector<16x1xf32>
    %367 = arith.addf %363, %366 : vector<16x1xf32>
    %368 = math.rsqrt %367 : vector<16x1xf32>
    %369 = vector.broadcast %368 : vector<16x1xf32> to vector<16x32xf32>
    %370 = arith.mulf %365, %369 : vector<16x32xf32>
    %371 = vector.broadcast %350 : vector<1x32xf32> to vector<16x32xf32>
    %372 = arith.mulf %370, %371 : vector<16x32xf32>
    %373 = vector.broadcast %352 : vector<1x32xf32> to vector<16x32xf32>
    %374 = arith.addf %372, %373 : vector<16x32xf32>
    %c1_162 = arith.constant 1 : index
    %c0_163 = arith.constant 0 : index
    %c0_164 = arith.constant 0 : index
    %375 = vector.load %arg14[%c1_162, %c0_163, %c0_164] : memref<2x32x64xf32, #tpu.memory_space<vmem>>, vector<1x32x64xf32>
    %376 = vector.shape_cast %375 : vector<1x32x64xf32> to vector<32x64xf32>
    %cst_165 = arith.constant dense<0.000000e+00> : vector<16x64xf32>
    %377 = tpu.matmul %374, %376, %cst_165 {dimension_numbers = #tpu.dot_dimension_numbers<[1], [0], [0], [1], [0, 0, 1, 1], [], []>} : vector<16x32xf32>, vector<32x64xf32>, vector<16x64xf32> -> vector<16x64xf32>
    %c1_166 = arith.constant 1 : index
    %c0_167 = arith.constant 0 : index
    %c0_168 = arith.constant 0 : index
    %378 = vector.load %arg15[%c1_166, %c0_167, %c0_168] : memref<2x1x64xf32, #tpu.memory_space<vmem>>, vector<1x1x64xf32>
    %379 = vector.shape_cast %378 : vector<1x1x64xf32> to vector<1x64xf32>
    %380 = vector.broadcast %379 : vector<1x64xf32> to vector<16x64xf32>
    %381 = arith.addf %377, %380 : vector<16x64xf32>
    %cst_169 = arith.constant 5.000000e-01 : f32
    %382 = vector.broadcast %cst_169 : f32 to vector<16x64xf32>
    %383 = arith.mulf %382, %381 : vector<16x64xf32>
    %cst_170 = arith.constant 4.471500e-02 : f32
    %384 = vector.broadcast %cst_170 : f32 to vector<16x64xf32>
    %385 = arith.mulf %384, %381 : vector<16x64xf32>
    %386 = arith.mulf %385, %381 : vector<16x64xf32>
    %387 = arith.mulf %386, %381 : vector<16x64xf32>
    %388 = arith.addf %381, %387 : vector<16x64xf32>
    %cst_171 = arith.constant 0.797884583 : f32
    %389 = vector.broadcast %cst_171 : f32 to vector<16x64xf32>
    %390 = arith.mulf %389, %388 : vector<16x64xf32>
    %391 = math.tanh %390 : vector<16x64xf32>
    %cst_172 = arith.constant 1.000000e+00 : f32
    %392 = vector.broadcast %cst_172 : f32 to vector<16x64xf32>
    %393 = arith.addf %392, %391 : vector<16x64xf32>
    %394 = arith.mulf %383, %393 : vector<16x64xf32>
    %c1_173 = arith.constant 1 : index
    %c0_174 = arith.constant 0 : index
    %c0_175 = arith.constant 0 : index
    %395 = vector.load %arg16[%c1_173, %c0_174, %c0_175] : memref<2x64x32xf32, #tpu.memory_space<vmem>>, vector<1x64x32xf32>
    %396 = vector.shape_cast %395 : vector<1x64x32xf32> to vector<64x32xf32>
    %cst_176 = arith.constant dense<0.000000e+00> : vector<16x32xf32>
    %397 = tpu.matmul %394, %396, %cst_176 {dimension_numbers = #tpu.dot_dimension_numbers<[1], [0], [0], [1], [0, 0, 1, 1], [], []>} : vector<16x64xf32>, vector<64x32xf32>, vector<16x32xf32> -> vector<16x32xf32>
    %c1_177 = arith.constant 1 : index
    %c0_178 = arith.constant 0 : index
    %c0_179 = arith.constant 0 : index
    %398 = vector.load %arg17[%c1_177, %c0_178, %c0_179] : memref<2x1x32xf32, #tpu.memory_space<vmem>>, vector<1x1x32xf32>
    %399 = vector.shape_cast %398 : vector<1x1x32xf32> to vector<1x32xf32>
    %400 = vector.broadcast %399 : vector<1x32xf32> to vector<16x32xf32>
    %401 = arith.addf %397, %400 : vector<16x32xf32>
    %402 = arith.addf %401, %374 : vector<16x32xf32>
    %c1_180 = arith.constant 1 : index
    %c0_181 = arith.constant 0 : index
    %c0_182 = arith.constant 0 : index
    %403 = vector.load %arg18[%c1_180, %c0_181, %c0_182] : memref<2x1x32xf32, #tpu.memory_space<vmem>>, vector<1x1x32xf32>
    %404 = vector.shape_cast %403 : vector<1x1x32xf32> to vector<1x32xf32>
    %c1_183 = arith.constant 1 : index
    %c0_184 = arith.constant 0 : index
    %c0_185 = arith.constant 0 : index
    %405 = vector.load %arg19[%c1_183, %c0_184, %c0_185] : memref<2x1x32xf32, #tpu.memory_space<vmem>>, vector<1x1x32xf32>
    %406 = vector.shape_cast %405 : vector<1x1x32xf32> to vector<1x32xf32>
    %cst_186 = arith.constant dense<0.000000e+00> : vector<16xf32>
    %407 = vector.multi_reduction <add>, %402, %cst_186 [1] : vector<16x32xf32> to vector<16xf32>
    %408 = vector.shape_cast %407 : vector<16xf32> to vector<16x1xf32>
    %cst_187 = arith.constant 3.200000e+01 : f32
    %409 = vector.broadcast %cst_187 : f32 to vector<16x1xf32>
    %410 = arith.divf %408, %409 : vector<16x1xf32>
    %411 = vector.broadcast %410 : vector<16x1xf32> to vector<16x32xf32>
    %412 = arith.subf %402, %411 : vector<16x32xf32>
    %413 = arith.mulf %412, %412 : vector<16x32xf32>
    %cst_188 = arith.constant dense<0.000000e+00> : vector<16xf32>
    %414 = vector.multi_reduction <add>, %413, %cst_188 [1] : vector<16x32xf32> to vector<16xf32>
    %415 = vector.shape_cast %414 : vector<16xf32> to vector<16x1xf32>
    %cst_189 = arith.constant 3.200000e+01 : f32
    %416 = vector.broadcast %cst_189 : f32 to vector<16x1xf32>
    %417 = arith.divf %415, %416 : vector<16x1xf32>
    %418 = vector.broadcast %410 : vector<16x1xf32> to vector<16x32xf32>
    %419 = arith.subf %402, %418 : vector<16x32xf32>
    %cst_190 = arith.constant 9.99999996E-13 : f32
    %420 = vector.broadcast %cst_190 : f32 to vector<16x1xf32>
    %421 = arith.addf %417, %420 : vector<16x1xf32>
    %422 = math.rsqrt %421 : vector<16x1xf32>
    %423 = vector.broadcast %422 : vector<16x1xf32> to vector<16x32xf32>
    %424 = arith.mulf %419, %423 : vector<16x32xf32>
    %425 = vector.broadcast %404 : vector<1x32xf32> to vector<16x32xf32>
    %426 = arith.mulf %424, %425 : vector<16x32xf32>
    %427 = vector.broadcast %406 : vector<1x32xf32> to vector<16x32xf32>
    %428 = arith.addf %426, %427 : vector<16x32xf32>
    %429 = tpu.iota {dimensions = array<i32: 0>} : vector<2x16xi32>
    %430 = tpu.iota {dimensions = array<i32: 1>} : vector<2x16xi32>
    %c8_i32_191 = arith.constant 8 : i32
    %431 = vector.broadcast %c8_i32_191 : i32 to vector<2x16xi32>
    %432 = arith.muli %429, %431 : vector<2x16xi32>
    %433 = arith.cmpi eq, %430, %432 : vector<2x16xi32>
    %434 = arith.extui %433 : vector<2x16xi1> to vector<2x16xi32>
    %435 = arith.sitofp %434 : vector<2x16xi32> to vector<2x16xf32>
    %cst_192 = arith.constant dense<0.000000e+00> : vector<2x32xf32>
    %436 = tpu.matmul %435, %428, %cst_192 {dimension_numbers = #tpu.dot_dimension_numbers<[1], [0], [0], [1], [0, 0, 1, 1], [], []>} : vector<2x16xf32>, vector<16x32xf32>, vector<2x32xf32> -> vector<2x32xf32>
    %c0_193 = arith.constant 0 : index
    %c0_194 = arith.constant 0 : index
    %437 = vector.load %arg20[%c0_193, %c0_194] : memref<32x32xf32, #tpu.memory_space<vmem>>, vector<32x32xf32>
    %cst_195 = arith.constant dense<0.000000e+00> : vector<2x32xf32>
    %438 = tpu.matmul %436, %437, %cst_195 {dimension_numbers = #tpu.dot_dimension_numbers<[1], [0], [0], [1], [0, 0, 1, 1], [], []>} : vector<2x32xf32>, vector<32x32xf32>, vector<2x32xf32> -> vector<2x32xf32>
    %c0_196 = arith.constant 0 : index
    %c0_197 = arith.constant 0 : index
    %439 = vector.load %arg21[%c0_196, %c0_197] : memref<1x32xf32, #tpu.memory_space<vmem>>, vector<1x32xf32>
    %440 = vector.broadcast %439 : vector<1x32xf32> to vector<2x32xf32>
    %441 = arith.addf %438, %440 : vector<2x32xf32>
    %442 = math.tanh %441 : vector<2x32xf32>
    %c0_198 = arith.constant 0 : index
    %c0_199 = arith.constant 0 : index
    %443 = vector.load %arg22[%c0_198, %c0_199] : memref<32x3xf32, #tpu.memory_space<vmem>>, vector<32x3xf32>
    %cst_200 = arith.constant dense<0.000000e+00> : vector<2x3xf32>
    %444 = tpu.matmul %442, %443, %cst_200 {dimension_numbers = #tpu.dot_dimension_numbers<[1], [0], [0], [1], [0, 0, 1, 1], [], []>} : vector<2x32xf32>, vector<32x3xf32>, vector<2x3xf32> -> vector<2x3xf32>
    %c0_201 = arith.constant 0 : index
    %c0_202 = arith.constant 0 : index
    %445 = vector.load %arg23[%c0_201, %c0_202] : memref<1x3xf32, #tpu.memory_space<vmem>>, vector<1x3xf32>
    %446 = vector.broadcast %445 : vector<1x3xf32> to vector<2x3xf32>
    %447 = arith.addf %444, %446 : vector<2x3xf32>
    %cst_203 = arith.constant dense<0xFF800000> : vector<2xf32>
    %448 = vector.multi_reduction <maximumf>, %447, %cst_203 [1] : vector<2x3xf32> to vector<2xf32>
    %449 = vector.shape_cast %448 : vector<2xf32> to vector<2x1xf32>
    %450 = vector.broadcast %449 : vector<2x1xf32> to vector<2x3xf32>
    %451 = arith.subf %447, %450 : vector<2x3xf32>
    %452 = math.exp %451 : vector<2x3xf32>
    %cst_204 = arith.constant dense<0.000000e+00> : vector<2xf32>
    %453 = vector.multi_reduction <add>, %452, %cst_204 [1] : vector<2x3xf32> to vector<2xf32>
    %454 = vector.shape_cast %453 : vector<2xf32> to vector<2x1xf32>
    %455 = math.log %454 : vector<2x1xf32>
    %456 = vector.broadcast %455 : vector<2x1xf32> to vector<2x3xf32>
    %457 = arith.subf %451, %456 : vector<2x3xf32>
    %c0_205 = arith.constant 0 : index
    %c0_206 = arith.constant 0 : index
    %458 = vector.load %arg24[%c0_205, %c0_206] : memref<2x3xf32, #tpu.memory_space<vmem>>, vector<2x3xf32>
    tpu.vector_store %arg24[%c0_205, %c0_206], %457 {strides = array<i32>} : memref<2x3xf32, #tpu.memory_space<vmem>>, vector<2x3xf32>,
    return
  }
}

</mosaic_0001>

<bundles_post_ra>
// kernel: bert_arch_forward.1
= control target key start
LH: loop header
LB: loop body
LE: loop exit
PB: predicated region body
PF: predicated region fallthrough
CT: control target
= control target key end

     0   :  { %s5481_s0 = inlined_call_operand.vmem [shape: f32[16,32], index: 0, kind: input, shape index: {}]   ;;  %s5482_s1 = inlined_call_operand.vmem [shape: f32[16,16], index: 1, kind: input, shape index: {}]   ;;  %s5483_s2 = inlined_call_operand.vmem [shape: f32[1,32], index: 2, kind: input, shape index: {}]   ;;  %s5484_s3 = inlined_call_operand.vmem [shape: f32[1,32], index: 3, kind: input, shape index: {}]   ;;  %s5485_s4 = inlined_call_operand.vmem [shape: f32[2,32,32], index: 4, kind: input, shape index: {}]   ;;  %s5486_s5 = inlined_call_operand.vmem [shape: f32[2,1,32], index: 5, kind: input, shape index: {}]   ;;  %s5487_s6 = inlined_call_operand.vmem [shape: f32[2,32,32], index: 6, kind: input, shape index: {}]   ;;  %s5488_s7 = inlined_call_operand.vmem [shape: f32[2,1,32], index: 7, kind: input, shape index: {}]   ;;  %s5489_s8 = inlined_call_operand.vmem [shape: f32[2,32,32], index: 8, kind: input, shape index: {}]   ;;  %s5490_s9 = inlined_call_operand.vmem [shape: f32[2,1,32], index: 9, kind: input, shape index: {}]   ;;  %s5491_s10 = inlined_call_operand.vmem [shape: f32[2,32,32], index: 10, kind: input, shape index: {}]   ;;  %s5492_s11 = inlined_call_operand.vmem [shape: f32[2,1,32], index: 11, kind: input, shape index: {}]   ;;  %s5493_s12 = inlined_call_operand.vmem [shape: f32[2,1,32], index: 12, kind: input, shape index: {}]   ;;  %s5494_s13 = inlined_call_operand.vmem [shape: f32[2,1,32], index: 13, kind: input, shape index: {}]   ;;  %s5495_s14 = inlined_call_operand.vmem [shape: f32[2,32,64], index: 14, kind: input, shape index: {}]   ;;  %s5496_s15 = inlined_call_operand.vmem [shape: f32[2,1,64], index: 15, kind: input, shape index: {}]   ;;  %s5497_s16 = inlined_call_operand.vmem [shape: f32[2,64,32], index: 16, kind: input, shape index: {}]   ;;  %s5498_s17 = inlined_call_operand.vmem [shape: f32[2,1,32], index: 17, kind: input, shape index: {}]   ;;  %s5499_s18 = inlined_call_operand.vmem [shape: f32[2,1,32], index: 18, kind: input, shape index: {}]   ;;  %s5500_s19 = inlined_call_operand.vmem [shape: f32[2,1,32], index: 19, kind: input, shape index: {}]   ;;  %s5501_s20 = inlined_call_operand.vmem [shape: f32[32,32], index: 20, kind: input, shape index: {}]   ;;  %s5502_s21 = inlined_call_operand.vmem [shape: f32[1,32], index: 21, kind: input, shape index: {}]   ;;  %s5503_s22 = inlined_call_operand.vmem [shape: f32[32,3], index: 22, kind: input, shape index: {}]   ;;  %s5504_s23 = inlined_call_operand.vmem [shape: f32[1,3], index: 23, kind: input, shape index: {}]   ;;  %s5505_s24 = inlined_call_operand.hbm [shape: f32[2,3], index: 24, kind: output, shape index: {}]  }
   0x1   :  { %5513 = sst [smem:[#allocation5_spill]] %s5481_s0 }
   0x2   :  { %5514 = sst [smem:[#allocation6_spill]] %s5482_s1 }
   0x3   :  { %5515 = sst [smem:[#allocation7_spill]] %s5483_s2 }
   0x4   :  { %5516 = sst [smem:[#allocation8_spill]] %s5484_s3 }
   0x5   :  { %5517 = sst [smem:[#allocation9_spill]] %s5485_s4 }
   0x6   :  { %5518 = sst [smem:[#allocation10_spill]] %s5486_s5 }
   0x7   :  { %5519 = sst [smem:[#allocation11_spill]] %s5487_s6 }
   0x8   :  { %5520 = sst [smem:[#allocation12_spill]] %s5488_s7 }
   0x9   :  { %5521 = sst [smem:[#allocation13_spill]] %s5489_s8 }
   0xa   :  { %5522 = sst [smem:[#allocation14_spill]] %s5505_s24 }
   0xb   :  { %s5523_s27 = sld [smem:[#allocation5_spill]]  ;;  %vm82_vm0 = vcmask 261120  }
  0x11   :  { %v78_v0 = vld [vmem:[%s5523_s27] sm:$0xff]  ;;  %v79_v1 = vld [vmem:[%s5523_s27 + $0x8] sm:$0xff] }
  0x12   :  { %29 = vsyncpa [#allocation3], 0  ;;  %v83_v2 = vsel %vm82_vm0, %v78_v0, 0.0  ;;  %v86_v3 = vsel %vm82_vm0, %v79_v1, 0.0  ;;  %s5524_s0 = sld [smem:[#allocation9_spill]]  ;;  %v128_v42 = vlaneseq  ;;  %v4597_v55 = vmov 0.0  }
  0x13   :  { %84 = vadd.xlane.f32.xlu0 %v83_v2  ;;  %s5525_s3 = sld [smem:[#allocation11_spill]]  ;;  %v3782_v58 = vld [vmem:[%s5490_s9] ss:$0 sm:$0xff]  ;;  %vm509_vm8 = vcmask 130048   ;;  %vm1687_vm12 = vcmask 523264   ;;  %vm4598_vm13 = vmmov 0  }
  0x14   :  { %s5526_s8 = sld [smem:[#allocation13_spill]]  ;;  %v4794_v43 = vand.u32 127, %v128_v42  ;;  %vm3742_vm15 = vcmask 17408  }
  0x15   :  { %s5527_s5 = sld [smem:[#allocation7_spill]] }
  0x16   :  { %s5528_s28 = sld [smem:[#allocation8_spill]]  ;;  %vm131_vm1 = vcmp.lt.s32.totalorder %v4794_v43, 8  ;;  %vm135_vm2 = vcmp.ge.s32.totalorder %v4794_v43, 8  ;;  %vm136_vm3 = vcmp.lt.s32.totalorder %v4794_v43, 16  ;;  %vm140_vm5 = vcmp.ge.s32.totalorder %v4794_v43, 16 }
  0x17   :  { %87 = vadd.xlane.f32.xlu0 %v86_v3  ;;  %v4818_v56 = vsel %vm131_vm1, 1.0, %v4597_v55  ;;  %vm137_vm4 = vmand %vm135_vm2, %vm136_vm3  ;;  %vm141_vm6 = vcmp.lt.s32.totalorder %v4794_v43, 24  ;;  %s5531_s29 = sld [smem:[#allocation6_spill]]  ;;  %vm145_vm9 = vcmp.ge.s32.totalorder %v4794_v43, 24  ;;  %vm146_vm10 = vcmp.lt.s32.totalorder %v4794_v43, 32 }
  0x18   :  { %v153_v14 = vld [vmem:[%s5524_s0 + $0x18] sm:$0xff]  ;;  %v152_v16 = vld [vmem:[%s5524_s0 + $0x10] sm:$0xff]  ;;  %v151_v18 = vld [vmem:[%s5524_s0 + $0x8] sm:$0xff]  ;;  %v4830_v61 = vsel %vm137_vm4, 1.0, %v4597_v55 }
  0x19   :  { %v245_v15 = vld [vmem:[%s5525_s3 + $0x18] sm:$0xff]  ;;  %4117 = vmatprep.subr.mxu0 %v153_v14  ;;  %v244_v17 = vld [vmem:[%s5525_s3 + $0x10] sm:$0xff]  ;;  %v243_v19 = vld [vmem:[%s5525_s3 + $0x8] sm:$0xff] }
  0x1a   :  { %4128 = vmatprep.subr.mxu1 %v245_v15  ;;  %4118 = vmatpush3.msra.mxu0 %v153_v14  ;;  %v150_v20 = vld [vmem:[%s5524_s0] sm:$0xff]  ;;  %v331_v22 = vld [vmem:[%s5526_s8 + $0x18] sm:$0xff]  ;;  %v330_v39 = vld [vmem:[%s5526_s8 + $0x10] sm:$0xff] }
  0x1b   :  { %4129 = vmatpush3.msra.mxu1 %v245_v15  ;;  %4119 = vmatprep.subr.mxu0 %v152_v16  ;;  %v242_v21 = vld [vmem:[%s5525_s3] sm:$0xff]  ;;  %v329_v40 = vld [vmem:[%s5526_s8 + $0x8] sm:$0xff]  ;;  %vm142_vm7 = vmand %vm140_vm5, %vm141_vm6 }
  0x1c   :  { %4130 = vmatprep.subr.mxu1 %v244_v17  ;;  %4120 = vmatpush3.msra.mxu0 %v152_v16  ;;  %v3770_v30 = vld [vmem:[%s5527_s5] ss:$0 sm:$0xff]  ;;  %s5529_s5 = sld [smem:[#allocation10_spill]]  ;;  %vm147_vm11 = vmand %vm145_vm9, %vm146_vm10 }
  0x1d   :  { %4131 = vmatpush3.msra.mxu1 %v244_v17  ;;  %4121 = vmatprep.subr.mxu0 %v151_v18  ;;  %v3771_v32 = vld [vmem:[%s5528_s28] ss:$0 sm:$0xff]  ;;  %s5530_s28 = sld [smem:[#allocation12_spill]] }
  0x1e   :  { %4122 = vmatpush3.msra.mxu0 %v151_v18  ;;  %4132 = vmatprep.subr.mxu1 %v243_v19  ;;  %v328_v41 = vld [vmem:[%s5526_s8] sm:$0xff] }
  0x1f   :  { %4123 = vmatprep.subr.mxu0 %v150_v20  ;;  %4133 = vmatpush3.msra.mxu1 %v243_v19  ;;  %v4909_v15 = vld [vmem:[%s5531_s29] sm:$0xff] }
  0x20   :  { %4124 = vmatpush3.msra.mxu0 %v150_v20  ;;  %4134 = vmatprep.subr.mxu1 %v242_v21 }
  0x21   :  { %4135 = vmatpush3.msra.mxu1 %v242_v21  ;;  %4139 = vmatprep.subr.mxu0 %v331_v22 }
  0x22   :  { %v3776_v44 = vld [vmem:[%s5529_s5] ss:$0 sm:$0xff] }
  0x23   :  { %v3779_v45 = vld [vmem:[%s5530_s28] ss:$0 sm:$0xff] }
  0x9c   :  { %v85_v4 = vpop.xlane.xlu0 %84 }
  0x9d   :  { %v90_v5 = vmul.f32 0.03125, %v85_v4 }
  0x9f   :  { %v92_v6 = vsub.f32 %v78_v0, %v90_v5  ;;  %v4856_v5 = vld [vmem:[%s5491_s10 + $0x18] sm:$0xff] }
  0xa0   :  { %v88_v7 = vpop.xlane.xlu0 %87 }
  0xa1   :  { %v91_v8 = vmul.f32 0.03125, %v88_v7  ;;  %v94_v9 = vmul.f32 %v92_v6, %v92_v6 }
  0xa3   :  { %v93_v10 = vsub.f32 %v79_v1, %v91_v8  ;;  %v96_v11 = vsel %vm82_vm0, %v94_v9, 0.0  ;;  %v4873_v8 = vld [vmem:[%s5491_s10 + $0x10] sm:$0xff]  ;;  %v4880_v9 = vld [vmem:[%s5491_s10 + $0x8] sm:$0xff] }
  0xa4   :  { %97 = vadd.xlane.f32.xlu1 %v96_v11  ;;  %v4891_v11 = vsel %vm142_vm7, 1.0, %v4597_v55 }
  0xa5   :  { %v95_v12 = vmul.f32 %v93_v10, %v93_v10 }
  0xa7   :  { %v99_v13 = vsel %vm82_vm0, %v95_v12, 0.0 }
  0xa8   :  { %100 = vadd.xlane.f32.xlu1 %v99_v13  ;;  %v4904_v13 = vld [vmem:[%s5531_s29 + $0x8] sm:$0xff] }
 0x12d   :  { %v98_v23 = vpop.xlane.xlu1 %97 }
 0x12e   :  { %v102_v24 = vmul.f32 0.03125, %v98_v23 }
 0x130   :  { %v104_v25 = vadd.f32 1e-12, %v102_v24 }
 0x131   :  { %v101_v26 = vpop.xlane.xlu1 %100 }
 0x132   :  { %4475 = vrsqrt.f32 %v104_v25  ;;  %v103_v27 = vmul.f32 0.03125, %v101_v26 }
 0x134   :  { %v105_v28 = vadd.f32 1e-12, %v103_v27 }
 0x136   :  { %4477 = vrsqrt.f32 %v105_v28 }
 0x13f   :  { %v4476_v29 = vpop.eup %4475 }
 0x140   :  { %v108_v31 = vmul.f32 %v4476_v29, %v92_v6 }
 0x142   :  { %v116_v33 = vmul.f32 %v3770_v30, %v108_v31 }
 0x143   :  { %v4478_v34 = vpop.eup %4477 }
 0x144   :  { %v4768_v35 = vadd.f32 %v3771_v32, %v116_v33  ;;  %v109_v36 = vmul.f32 %v4478_v34, %v93_v10  ;;  %v4887_v10 = vld [vmem:[%s5491_s10] sm:$0xff] }
 0x146   :  { %4125 = vmatprep.mubr.msk.f32.mxu0 %vm82_vm0, %v4768_v35  ;;  %4136 = vmatprep.mubr.msk.f32.mxu1 %vm82_vm0, %v4768_v35  ;;  %v117_v37 = vmul.f32 %v3770_v30, %v109_v36 }
 0x148   :  { %v4774_v38 = vadd.f32 %v3771_v32, %v117_v37 }
 0x14a   :  { %4126 = vmatmul.mubr.msk.f32.vlgmr.msra.gmra.mxu0 %vm82_vm0, %v4774_v38  ;;  %4137 = vmatmul.mubr.msk.f32.vlgmr.msra.gmra.mxu1 %vm82_vm0, %v4774_v38 }
 0x14b   :  { %4140 = vmatpush3.msra.mxu0 %v331_v22  ;;  %4147 = vmatprep.mubr.msk.f32.mxu0 %vm82_vm0, %v4768_v35 }
 0x14c   :  { %4141 = vmatprep.subr.mxu0 %v330_v39 }
 0x14d   :  { %4142 = vmatpush3.msra.mxu0 %v330_v39 }
 0x14e   :  { %4143 = vmatprep.subr.mxu0 %v329_v40 }
 0x14f   :  { %4144 = vmatpush3.msra.mxu0 %v329_v40 }
 0x150   :  { %4145 = vmatprep.subr.mxu0 %v328_v41 }
 0x151   :  { %4146 = vmatpush3.msra.mxu0 %v328_v41 }
 0x152   :  { %4148 = vmatmul.mubr.msk.f32.vlgmr.msra.gmra.mxu0 %vm82_vm0, %v4774_v38 }
 0x20a   :  { %v4127_v46 = vpop.f32.mrf.mxu0  ;;  %v4138_v47 = vpop.f32.mrf.mxu1 }
 0x20b   :  { %v239_v48 = vadd.f32 %v4127_v46, %v3776_v44  ;;  %v4802_v49 = vadd.f32 %v4138_v47, %v3779_v45 }
 0x20c   :  { %v233_v50 = vpop.f32.mrf.mxu0  ;;  %v319_v51 = vpop.f32.mrf.mxu1 }
 0x20d   :  { %v234_v52 = vadd.f32 %v3776_v44, %v233_v50  ;;  %v4807_v53 = vadd.f32 %v3779_v45, %v319_v51  ;;  %4150 = vmatprep.subr.msk.mxu1 %vm82_vm0, %v4802_v49  ;;  %v4813_v54 = vmul.f32 0.35355338, %v239_v48 }
 0x20e   :  { %4151 = vmatpush3.xpose.msk.msra.mxu1 %vm82_vm0, %v4802_v49 }
 0x20f   :  { %4152 = vmatprep.subr.msk.mxu1 %vm82_vm0, %v4807_v53  ;;  %v4820_v57 = vmul.f32 0.35355338, %v234_v52  ;;  %v421_v62 = vmul.f32 %v4818_v56, %v4813_v54  ;;  %v616_v7 = vmul.f32 %v4830_v61, %v4813_v54 }
 0x211   :  { %v420_v60 = vmul.f32 %v4818_v56, %v4820_v57  ;;  %v615_v1 = vmul.f32 %v4830_v61, %v4820_v57 }
 0x212   :  { %v4149_v59 = vpop.f32.mrf.mxu0  ;;  %4153 = vmatpush3.xpose.msk.msra.mxu1 %vm82_vm0, %v4807_v53 }
 0x213   :  { %v4834_v63 = vadd.f32 %v4149_v59, %v3782_v58  ;;  %4164 = vmatprep.subr.msk.mxu1 %vm82_vm0, %v4802_v49  ;;  %4154 = vmatprep.mubr.msk.f32.mxu1 %vm82_vm0, %v420_v60 }
 0x214   :  { %v405_v0 = vpop.f32.mrf.mxu0 }
 0x215   :  { %v4841_v2 = vadd.f32 %v3782_v58, %v405_v0  ;;  %4155 = vmatmul.mubr.msk.f32.vlgmr.msra.gmra.mxu1 %vm82_vm0, %v421_v62  ;;  %v533_v3 = vmul.f32 %v4818_v56, %v4834_v63  ;;  %v4860_v6 = vmul.f32 %v4830_v61, %v4834_v63  ;;  %v4897_v12 = vmul.f32 %v4891_v11, %v4834_v63 }
 0x216   :  { %4165 = vmatpush3.xpose.msk.msra.mxu1 %vm82_vm0, %v4802_v49  ;;  %4168 = vmatprep.mubr.msk.f32.mxu1 %vm82_vm0, %v615_v1 }
 0x217   :  { %4157 = vmatprep.subr.mxu0 %v533_v3  ;;  %4166 = vmatprep.subr.msk.mxu1 %vm82_vm0, %v4807_v53  ;;  %v532_v4 = vmul.f32 %v4818_v56, %v4841_v2 }
 0x218   :  { %4158 = vmatpush3.msra.mxu0 %v533_v3 }
 0x219   :  { %4159 = vmatprep.subr.mxu0 %v532_v4 }
 0x21a   :  { %4160 = vmatpush3.msra.mxu0 %v532_v4  ;;  %4167 = vmatpush3.xpose.msk.msra.mxu1 %vm82_vm0, %v4807_v53  ;;  %v720_v4 = vmul.f32 %v4830_v61, %v4841_v2 }
 0x21b   :  { %4171 = vmatprep.subr.mxu0 %v4860_v6  ;;  %4189 = vmatprep.subr.mxu1 %v4856_v5 }
 0x21d   :  { %4169 = vmatmul.mubr.msk.f32.vlgmr.msra.gmra.mxu1 %vm82_vm0, %v616_v7 }
 0x21e   :  { %4190 = vmatpush3.msra.mxu1 %v4856_v5 }
 0x21f   :  { %4191 = vmatprep.subr.mxu1 %v4873_v8 }
 0x220   :  { %4192 = vmatpush3.msra.mxu1 %v4873_v8 }
 0x221   :  { %4193 = vmatprep.subr.mxu1 %v4880_v9 }
 0x222   :  { %4194 = vmatpush3.msra.mxu1 %v4880_v9 }
 0x223   :  { %4195 = vmatprep.subr.mxu1 %v4887_v10 }
 0x224   :  { %4196 = vmatpush3.msra.mxu1 %v4887_v10 }
 0x225   :  { %4207 = vmatprep.subr.mxu1 %v4897_v12 }
 0x2d5   :  { %v4156_v14 = vpop.f32.mrf.mxu1 }
 0x2d6   :  { %v506_v16 = vadd.f32 %v4156_v14, %v4904_v13 }
 0x2d7   :  { %v500_v17 = vpop.f32.mrf.mxu1 }
 0x2d8   :  { %v501_v18 = vadd.f32 %v500_v17, %v4909_v15  ;;  %v513_v19 = vsel %vm509_vm8, %v506_v16, -inf }
 0x2d9   :  { %514 = vmax.xlane.f32.xlu1 %v513_v19  ;;  %v1070_v19 = vmul.f32 %v4891_v11, %v4841_v2 }
 0x2da   :  { %v510_v20 = vsel %vm509_vm8, %v501_v18, -inf }
 0x2db   :  { %511 = vmax.xlane.f32.xlu0 %v510_v20 }
 0x2dd   :  { %v4170_v21 = vpop.f32.mrf.mxu1 }
 0x2de   :  { %v695_v22 = vadd.f32 %v4170_v21, %v4904_v13 }
 0x2df   :  { %v689_v23 = vpop.f32.mrf.mxu1 }
 0x2e0   :  { %v690_v24 = vadd.f32 %v689_v23, %v4909_v15  ;;  %v701_v25 = vsel %vm509_vm8, %v695_v22, -inf  ;;  %v966_v23 = vmul.f32 %v4891_v11, %v4813_v54 }
 0x2e1   :  { %702 = vmax.xlane.f32.xlu1 %v701_v25 }
 0x2e2   :  { %v698_v26 = vsel %vm509_vm8, %v690_v24, -inf }
 0x2e3   :  { %699 = vmax.xlane.f32.xlu0 %v698_v26 }
 0x362   :  { %v515_v27 = vpop.xlane.xlu1 %514 }
 0x363   :  { %v517_v28 = vsub.f32 %v506_v16, %v515_v27 }
 0x364   :  { %v512_v29 = vpop.xlane.xlu0 %511 }
 0x365   :  { %v520_v30 = vmul.f32 1.442695, %v517_v28  ;;  %v516_v31 = vsub.f32 %v501_v18, %v512_v29 }
 0x367   :  { %4479 = vpow2.f32 %v520_v30  ;;  %v518_v32 = vmul.f32 1.442695, %v516_v31 }
 0x369   :  { %4481 = vpow2.f32 %v518_v32 }
 0x36a   :  { %v703_v33 = vpop.xlane.xlu1 %702 }
 0x36b   :  { %v705_v34 = vsub.f32 %v695_v22, %v703_v33  ;;  %v965_v22 = vmul.f32 %v4891_v11, %v4820_v57 }
 0x36c   :  { %v700_v36 = vpop.xlane.xlu0 %699 }
 0x36d   :  { %v708_v37 = vmul.f32 1.442695, %v705_v34  ;;  %v704_v39 = vsub.f32 %v690_v24, %v700_v36 }
 0x36f   :  { %4483 = vpow2.f32 %v708_v37  ;;  %v706_v40 = vmul.f32 1.442695, %v704_v39 }
 0x371   :  { %4485 = vpow2.f32 %v706_v40 }
 0x374   :  { %v4480_v41 = vpop.eup %4479 }
 0x375   :  { %v525_v44 = vsel %vm509_vm8, %v4480_v41, 0.0 }
 0x376   :  { %v4482_v45 = vpop.eup %4481  ;;  %526 = vadd.xlane.f32.xlu1 %v525_v44 }
 0x377   :  { %v522_v46 = vsel %vm509_vm8, %v4482_v45, 0.0 }
 0x378   :  { %523 = vadd.xlane.f32.xlu0 %v522_v46 }
 0x37c   :  { %v4484_v47 = vpop.eup %4483 }
 0x37d   :  { %v713_v48 = vsel %vm509_vm8, %v4484_v47, 0.0 }
 0x37e   :  { %v4486_v50 = vpop.eup %4485  ;;  %714 = vadd.xlane.f32.xlu1 %v713_v48 }
 0x37f   :  { %v710_v51 = vsel %vm509_vm8, %v4486_v50, 0.0 }
 0x380   :  { %711 = vadd.xlane.f32.xlu0 %v710_v51 }
 0x3ff   :  { %v527_v52 = vpop.xlane.xlu1 %526 }
 0x400   :  { %4487 = vrcp.f32 %v527_v52 }
 0x401   :  { %v524_v58 = vpop.xlane.xlu0 %523 }
 0x402   :  { %4489 = vrcp.f32 %v524_v58 }
 0x407   :  { %v715_v59 = vpop.xlane.xlu1 %714 }
 0x408   :  { %4491 = vrcp.f32 %v715_v59 }
 0x409   :  { %v712_v60 = vpop.xlane.xlu0 %711 }
 0x40a   :  { %4493 = vrcp.f32 %v712_v60 }
 0x40d   :  { %v4488_v62 = vpop.eup %4487 }
 0x40e   :  { %v531_v3 = vmul.f32 %v4488_v62, %v4480_v41 }
 0x40f   :  { %v4490_v0 = vpop.eup %4489 }
 0x410   :  { %v530_v1 = vmul.f32 %v4490_v0, %v4482_v45 }
 0x412   :  { %4161 = vmatprep.mubr.msk.f32.mxu0 %vm509_vm8, %v530_v1 }
 0x413   :  { %4162 = vmatmul.mubr.msk.f32.vlgmr.msra.gmra.mxu0 %vm509_vm8, %v531_v3 }
 0x414   :  { %4172 = vmatpush3.msra.mxu0 %v4860_v6 }
 0x415   :  { %4173 = vmatprep.subr.mxu0 %v720_v4  ;;  %v4492_v7 = vpop.eup %4491 }
 0x416   :  { %4174 = vmatpush3.msra.mxu0 %v720_v4  ;;  %v719_v17 = vmul.f32 %v4492_v7, %v4484_v47 }
 0x417   :  { %v4494_v14 = vpop.eup %4493  ;;  %4178 = vmatprep.subr.mxu0 %v4856_v5 }
 0x418   :  { %v718_v16 = vmul.f32 %v4494_v14, %v4486_v50 }
 0x41a   :  { %4175 = vmatprep.mubr.msk.f32.mxu0 %vm509_vm8, %v718_v16 }
 0x41b   :  { %4176 = vmatmul.mubr.msk.f32.vlgmr.msra.gmra.mxu0 %vm509_vm8, %v719_v17 }
 0x41c   :  { %4179 = vmatpush3.msra.mxu0 %v4856_v5 }
 0x41d   :  { %4180 = vmatprep.subr.mxu0 %v4873_v8 }
 0x41e   :  { %4181 = vmatpush3.msra.mxu0 %v4873_v8 }
 0x41f   :  { %4182 = vmatprep.subr.mxu0 %v4880_v9 }
 0x420   :  { %4183 = vmatpush3.msra.mxu0 %v4880_v9 }
 0x421   :  { %4184 = vmatprep.subr.mxu0 %v4887_v10 }
 0x422   :  { %4185 = vmatpush3.msra.mxu0 %v4887_v10 }
 0x423   :  { %4200 = vmatprep.subr.msk.mxu0 %vm82_vm0, %v4802_v49 }
 0x4d3   :  { %v4163_v6 = vpop.f32.mrf.mxu0 }
 0x4d5   :  { %v606_v18 = vpop.f32.mrf.mxu0 }
 0x4d6   :  { %4197 = vmatprep.mubr.msk.f32.mxu1 %vm82_vm0, %v606_v18 }
 0x4d7   :  { %4198 = vmatmul.mubr.msk.f32.vlgmr.msra.gmra.mxu1 %vm82_vm0, %v4163_v6 }
 0x4d8   :  { %4208 = vmatpush3.msra.mxu1 %v4897_v12  ;;  %v4960_v12 = vsel %vm147_vm11, 1.0, %v4597_v55 }
 0x4d9   :  { %4209 = vmatprep.subr.mxu1 %v1070_v19  ;;  %v1236_v24 = vmul.f32 %v4960_v12, %v4820_v57  ;;  %v1237_v25 = vmul.f32 %v4960_v12, %v4813_v54 }
 0x4da   :  { %4210 = vmatpush3.msra.mxu1 %v1070_v19 }
 0x4db   :  { %v4177_v20 = vpop.f32.mrf.mxu0  ;;  %4214 = vmatprep.subr.mxu1 %v4856_v5 }
 0x4dd   :  { %v794_v21 = vpop.f32.mrf.mxu0 }
 0x4de   :  { %4186 = vmatprep.mubr.msk.f32.mxu0 %vm82_vm0, %v794_v21 }
 0x4df   :  { %4187 = vmatmul.mubr.msk.f32.vlgmr.msra.gmra.mxu0 %vm82_vm0, %v4177_v20 }
 0x4e0   :  { %4201 = vmatpush3.xpose.msk.msra.mxu0 %vm82_vm0, %v4802_v49  ;;  %4204 = vmatprep.mubr.msk.f32.mxu0 %vm82_vm0, %v965_v22 }
 0x4e1   :  { %4202 = vmatprep.subr.msk.mxu0 %vm82_vm0, %v4807_v53 }
 0x4e4   :  { %4203 = vmatpush3.xpose.msk.msra.mxu0 %vm82_vm0, %v4807_v53 }
 0x4e5   :  { %4225 = vmatprep.subr.msk.mxu0 %vm82_vm0, %v4802_v49 }
 0x4e7   :  { %4205 = vmatmul.mubr.msk.f32.vlgmr.msra.gmra.mxu0 %vm82_vm0, %v966_v23 }
 0x4e8   :  { %4226 = vmatpush3.xpose.msk.msra.mxu0 %vm82_vm0, %v4802_v49  ;;  %4229 = vmatprep.mubr.msk.f32.mxu0 %vm82_vm0, %v1236_v24 }
 0x4e9   :  { %4227 = vmatprep.subr.msk.mxu0 %vm82_vm0, %v4807_v53 }
 0x4ec   :  { %4228 = vmatpush3.xpose.msk.msra.mxu0 %vm82_vm0, %v4807_v53 }
 0x4ed   :  { %4239 = vmatprep.subr.mxu0 %v4856_v5 }
 0x4ef   :  { %4230 = vmatmul.mubr.msk.f32.vlgmr.msra.gmra.mxu0 %vm82_vm0, %v1237_v25 }
 0x4f0   :  { %4240 = vmatpush3.msra.mxu0 %v4856_v5 }
 0x4f1   :  { %4241 = vmatprep.subr.mxu0 %v4873_v8 }
 0x4f2   :  { %4242 = vmatpush3.msra.mxu0 %v4873_v8 }
 0x4f3   :  { %4243 = vmatprep.subr.mxu0 %v4880_v9 }
 0x4f4   :  { %4244 = vmatpush3.msra.mxu0 %v4880_v9 }
 0x4f5   :  { %4245 = vmatprep.subr.mxu0 %v4887_v10 }
 0x4f6   :  { %4246 = vmatpush3.msra.mxu0 %v4887_v10 }
 0x597   :  { %v4199_v49 = vpop.f32.mrf.mxu1 }
 0x599   :  { %v956_v22 = vpop.f32.mrf.mxu1 }
 0x59f   :  { %v4188_v53 = vpop.f32.mrf.mxu0 }
 0x5a0   :  { %v4987_v54 = vadd.f32 %v4199_v49, %v4188_v53 }
 0x5a1   :  { %v4989_v57 = vpop.f32.mrf.mxu0 }
 0x5a7   :  { %v4206_v26 = vpop.f32.mrf.mxu0 }
 0x5a8   :  { %v1045_v27 = vadd.f32 %v4206_v26, %v4904_v13  ;;  %v957_v26 = vadd.f32 %v956_v22, %v4989_v57 }
 0x5a9   :  { %v1039_v28 = vpop.f32.mrf.mxu0 }
 0x5aa   :  { %v1040_v29 = vadd.f32 %v1039_v28, %v4909_v15  ;;  %v1051_v30 = vsel %vm509_vm8, %v1045_v27, -inf }
 0x5ab   :  { %1052 = vmax.xlane.f32.xlu1 %v1051_v30 }
 0x5ac   :  { %v1048_v31 = vsel %vm509_vm8, %v1040_v29, -inf }
 0x5ad   :  { %1049 = vmax.xlane.f32.xlu0 %v1048_v31 }
 0x5af   :  { %v4231_v40 = vpop.f32.mrf.mxu0 }
 0x5b0   :  { %v1316_v45 = vadd.f32 %v4231_v40, %v4904_v13 }
 0x5b1   :  { %v1310_v44 = vpop.f32.mrf.mxu0 }
 0x5b2   :  { %v1311_v48 = vadd.f32 %v1310_v44, %v4909_v15  ;;  %v1322_v51 = vsel %vm509_vm8, %v1316_v45, -inf }
 0x5b4   :  { %v1319_v52 = vsel %vm509_vm8, %v1311_v48, -inf }
 0x634   :  { %v1053_v32 = vpop.xlane.xlu1 %1052 }
 0x635   :  { %v1055_v33 = vsub.f32 %v1045_v27, %v1053_v32  ;;  %v3817_v32 = vld [vmem:[%s5492_s11] ss:$0 sm:$0xff] }
 0x636   :  { %v1050_v34 = vpop.xlane.xlu0 %1049 }
 0x637   :  { %v1058_v36 = vmul.f32 1.442695, %v1055_v33  ;;  %v1054_v37 = vsub.f32 %v1040_v29, %v1050_v34 }
 0x639   :  { %4495 = vpow2.f32 %v1058_v36  ;;  %v1056_v39 = vmul.f32 1.442695, %v1054_v37 }
 0x63b   :  { %4497 = vpow2.f32 %v1056_v39 }
 0x646   :  { %v4496_v41 = vpop.eup %4495 }
 0x647   :  { %v1063_v46 = vsel %vm509_vm8, %v4496_v41, 0.0 }
 0x648   :  { %v4498_v47 = vpop.eup %4497  ;;  %1064 = vadd.xlane.f32.xlu1 %v1063_v46 }
 0x649   :  { %v1060_v50 = vsel %vm509_vm8, %v4498_v47, 0.0 }
 0x64a   :  { %1061 = vadd.xlane.f32.xlu0 %v1060_v50 }
 0x64c   :  { %1323 = vmax.xlane.f32.xlu1 %v1322_v51 }
 0x64e   :  { %1320 = vmax.xlane.f32.xlu0 %v1319_v52 }
 0x6d1   :  { %v1065_v58 = vpop.xlane.xlu1 %1064 }
 0x6d2   :  { %4499 = vrcp.f32 %v1065_v58 }
 0x6d3   :  { %v1062_v59 = vpop.xlane.xlu0 %1061 }
 0x6d4   :  { %4501 = vrcp.f32 %v1062_v59  ;;  %v1564_v59 = vld [vmem:[%s5495_s14 + $0x10] sm:$0xff] }
 0x6d5   :  { %v1324_v60 = vpop.xlane.xlu1 %1323 }
 0x6d6   :  { %v1326_v62 = vsub.f32 %v1316_v45, %v1324_v60  ;;  %v1563_v60 = vld [vmem:[%s5495_s14 + $0x8] sm:$0xff] }
 0x6d7   :  { %v1321_v0 = vpop.xlane.xlu0 %1320 }
 0x6d8   :  { %v1329_v1 = vmul.f32 1.442695, %v1326_v62  ;;  %v1325_v3 = vsub.f32 %v1311_v48, %v1321_v0  ;;  %v1562_v62 = vld [vmem:[%s5495_s14] sm:$0xff] }
 0x6da   :  { %4503 = vpow2.f32 %v1329_v1  ;;  %v1327_v4 = vmul.f32 1.442695, %v1325_v3 }
 0x6dc   :  { %4505 = vpow2.f32 %v1327_v4 }
 0x6df   :  { %v4500_v7 = vpop.eup %4499 }
 0x6e0   :  { %v1069_v17 = vmul.f32 %v4500_v7, %v4496_v41 }
 0x6e1   :  { %v4502_v14 = vpop.eup %4501 }
 0x6e2   :  { %v1068_v16 = vmul.f32 %v4502_v14, %v4498_v47 }
 0x6e4   :  { %4211 = vmatprep.mubr.msk.f32.mxu1 %vm509_vm8, %v1068_v16 }
 0x6e5   :  { %4212 = vmatmul.mubr.msk.f32.vlgmr.msra.gmra.mxu1 %vm509_vm8, %v1069_v17  ;;  %v3818_v17 = vld [vmem:[%s5493_s12] ss:$0 sm:$0xff] }
 0x6e6   :  { %4215 = vmatpush3.msra.mxu1 %v4856_v5  ;;  %v1342_v5 = vmul.f32 %v4960_v12, %v4834_v63  ;;  %v1341_v63 = vmul.f32 %v4960_v12, %v4841_v2 }
 0x6e7   :  { %v4504_v6 = vpop.eup %4503  ;;  %4216 = vmatprep.subr.mxu1 %v4873_v8 }
 0x6e8   :  { %4217 = vmatpush3.msra.mxu1 %v4873_v8  ;;  %v1334_v18 = vsel %vm509_vm8, %v4504_v6, 0.0 }
 0x6e9   :  { %v4506_v19 = vpop.eup %4505  ;;  %4218 = vmatprep.subr.mxu1 %v4880_v9  ;;  %1335 = vadd.xlane.f32.xlu1 %v1334_v18 }
 0x6ea   :  { %4219 = vmatpush3.msra.mxu1 %v4880_v9  ;;  %v1331_v20 = vsel %vm509_vm8, %v4506_v19, 0.0 }
 0x6eb   :  { %4220 = vmatprep.subr.mxu1 %v4887_v10  ;;  %1332 = vadd.xlane.f32.xlu0 %v1331_v20 }
 0x6ec   :  { %4221 = vmatpush3.msra.mxu1 %v4887_v10 }
 0x6ed   :  { %4232 = vmatprep.subr.mxu1 %v1342_v5 }
 0x772   :  { %v1336_v21 = vpop.xlane.xlu1 %1335 }
 0x774   :  { %v1333_v8 = vpop.xlane.xlu0 %1332 }
 0x775   :  { %4507 = vrcp.f32 %v1333_v8 }
 0x776   :  { %4509 = vrcp.f32 %v1336_v21 }
 0x782   :  { %v4508_v23 = vpop.eup %4507 }
 0x783   :  { %v4510_v9 = vpop.eup %4509  ;;  %v1339_v49 = vmul.f32 %v4508_v23, %v4506_v19  ;;  %v1679_v23 = vld [vmem:[%s5497_s16 + $0x38] sm:$0xff] }
 0x784   :  { %v1340_v10 = vmul.f32 %v4510_v9, %v4504_v6  ;;  %4261 = vmatprep.subr.mxu0 %v1679_v23  ;;  %v1676_v9 = vld [vmem:[%s5497_s16 + $0x20] sm:$0xff] }
 0x7a5   :  { %v4213_v24 = vpop.f32.mrf.mxu1 }
 0x7a7   :  { %v1144_v25 = vpop.f32.mrf.mxu1 }
 0x7a8   :  { %4222 = vmatprep.mubr.msk.f32.mxu1 %vm82_vm0, %v1144_v25  ;;  %v1677_v25 = vld [vmem:[%s5497_s16 + $0x28] sm:$0xff] }
 0x7a9   :  { %4223 = vmatmul.mubr.msk.f32.vlgmr.msra.gmra.mxu1 %vm82_vm0, %v4213_v24  ;;  %v1678_v24 = vld [vmem:[%s5497_s16 + $0x30] sm:$0xff] }
 0x7aa   :  { %4233 = vmatpush3.msra.mxu1 %v1342_v5  ;;  %4236 = vmatprep.mubr.msk.f32.mxu1 %vm509_vm8, %v1339_v49  ;;  %v3819_v5 = vld [vmem:[%s5494_s13] ss:$0 sm:$0xff]  ;;  %v1675_v49 = vld [vmem:[%s5497_s16 + $0x18] sm:$0xff] }
 0x7ab   :  { %4234 = vmatprep.subr.mxu1 %v1341_v63 }
 0x7ac   :  { %4235 = vmatpush3.msra.mxu1 %v1341_v63  ;;  %v1674_v63 = vld [vmem:[%s5497_s16 + $0x10] sm:$0xff] }
 0x7ad   :  { %4237 = vmatmul.mubr.msk.f32.vlgmr.msra.gmra.mxu1 %vm509_vm8, %v1340_v10  ;;  %v1673_v10 = vld [vmem:[%s5497_s16 + $0x8] sm:$0xff] }
 0x869   :  { %v4224_v53 = vpop.f32.mrf.mxu1 }
 0x86a   :  { %v1235_v27 = vadd.f32 %v4224_v53, %v4987_v54  ;;  %v1672_v53 = vld [vmem:[%s5497_s16] sm:$0xff] }
 0x86b   :  { %v1225_v28 = vpop.f32.mrf.mxu1 }
 0x86c   :  { %v1234_v29 = vadd.f32 %v1225_v28, %v957_v26  ;;  %v3820_v26 = vld [vmem:[%s5496_s15] ss:$0 sm:$0xff] }
 0x86d   :  { %v4238_v30 = vpop.f32.mrf.mxu1 }
 0x86f   :  { %v1415_v31 = vpop.f32.mrf.mxu1 }
 0x870   :  { %4247 = vmatprep.mubr.msk.f32.mxu0 %vm82_vm0, %v1415_v31 }
 0x871   :  { %4248 = vmatmul.mubr.msk.f32.vlgmr.msra.gmra.mxu0 %vm82_vm0, %v4238_v30 }
 0x872   :  { %4262 = vmatpush3.msra.mxu0 %v1679_v23  ;;  %v3845_v23 = vld [vmem:[%s5526_s8 + $0x28] sm:$0xff] }
 0x873   :  { %4263 = vmatprep.subr.mxu0 %v1678_v24 }
 0x874   :  { %4264 = vmatpush3.msra.mxu0 %v1678_v24  ;;  %v3828_v24 = vld [vmem:[%s5524_s0 + $0x20] sm:$0xff] }
 0x875   :  { %4265 = vmatprep.subr.mxu0 %v1677_v25 }
 0x876   :  { %4266 = vmatpush3.msra.mxu0 %v1677_v25  ;;  %v3844_v25 = vld [vmem:[%s5526_s8 + $0x20] sm:$0xff] }
 0x877   :  { %4267 = vmatprep.subr.mxu0 %v1676_v9 }
 0x878   :  { %4268 = vmatpush3.msra.mxu0 %v1676_v9  ;;  %v3839_v9 = vld [vmem:[%s5525_s3 + $0x38] sm:$0xff] }
 0x879   :  { %4269 = vmatprep.subr.mxu0 %v1675_v49 }
 0x87a   :  { %4270 = vmatpush3.msra.mxu0 %v1675_v49 }
 0x87b   :  { %4271 = vmatprep.subr.mxu0 %v1674_v63 }
 0x87c   :  { %4272 = vmatpush3.msra.mxu0 %v1674_v63 }
 0x87d   :  { %4273 = vmatprep.subr.mxu0 %v1673_v10 }
 0x87e   :  { %4274 = vmatpush3.msra.mxu0 %v1673_v10 }
 0x87f   :  { %4275 = vmatprep.subr.mxu0 %v1672_v53 }
 0x880   :  { %4276 = vmatpush3.msra.mxu0 %v1672_v53 }
 0x931   :  { %v4249_v2 = vpop.f32.mrf.mxu0 }
 0x932   :  { %v1506_v33 = vadd.f32 %v4249_v2, %v1235_v27 }
 0x933   :  { %v1496_v34 = vpop.f32.mrf.mxu0 }
 0x934   :  { %v1515_v36 = vadd.f32 %v3817_v32, %v1506_v33  ;;  %v1505_v37 = vadd.f32 %v1496_v34, %v1234_v29 }
 0x936   :  { %v1514_v57 = vadd.f32 %v3817_v32, %v1505_v37  ;;  %v1517_v54 = vadd.f32 %v1515_v36, %v4774_v38 }
 0x938   :  { %v1523_v39 = vsel %vm82_vm0, %v1517_v54, 0.0  ;;  %v1516_v40 = vadd.f32 %v1514_v57, %v4768_v35  ;;  %v1565_v35 = vld [vmem:[%s5495_s14 + $0x18] sm:$0xff] }
 0x939   :  { %1524 = vadd.xlane.f32.xlu1 %v1523_v39  ;;  %4250 = vmatprep.subr.mxu1 %v1565_v35 }
 0x93a   :  { %v1520_v41 = vsel %vm82_vm0, %v1516_v40, 0.0  ;;  %4251 = vmatpush3.msra.mxu1 %v1565_v35 }
 0x93b   :  { %1521 = vadd.xlane.f32.xlu0 %v1520_v41  ;;  %4252 = vmatprep.subr.mxu1 %v1564_v59 }
 0x93c   :  { %4253 = vmatpush3.msra.mxu1 %v1564_v59 }
 0x93d   :  { %4254 = vmatprep.subr.mxu1 %v1563_v60 }
 0x93e   :  { %4255 = vmatpush3.msra.mxu1 %v1563_v60 }
 0x93f   :  { %4256 = vmatprep.subr.mxu1 %v1562_v62 }
 0x940   :  { %4257 = vmatpush3.msra.mxu1 %v1562_v62 }
 0x9c2   :  { %v1525_v44 = vpop.xlane.xlu1 %1524 }
 0x9c3   :  { %v1527_v45 = vmul.f32 0.03125, %v1525_v44 }
 0x9c4   :  { %v1522_v46 = vpop.xlane.xlu0 %1521 }
 0x9c5   :  { %v1529_v47 = vsub.f32 %v1517_v54, %v1527_v45  ;;  %v1526_v48 = vmul.f32 0.03125, %v1522_v46 }
 0x9c7   :  { %v1528_v50 = vsub.f32 %v1516_v40, %v1526_v48  ;;  %v1531_v51 = vmul.f32 %v1529_v47, %v1529_v47 }
 0x9c9   :  { %v1535_v52 = vsel %vm82_vm0, %v1531_v51, 0.0  ;;  %v1530_v58 = vmul.f32 %v1528_v50, %v1528_v50  ;;  %v3823_v51 = vld [vmem:[%s5498_s17] ss:$0 sm:$0xff] }
 0x9ca   :  { %1536 = vadd.xlane.f32.xlu1 %v1535_v52 }
 0x9cb   :  { %v1532_v38 = vsel %vm82_vm0, %v1530_v58, 0.0 }
 0x9cc   :  { %1533 = vadd.xlane.f32.xlu0 %v1532_v38 }
 0xa53   :  { %v1537_v0 = vpop.xlane.xlu1 %1536 }
 0xa54   :  { %v1539_v1 = vmul.f32 0.03125, %v1537_v0 }
 0xa55   :  { %v1534_v3 = vpop.xlane.xlu0 %1533 }
 0xa56   :  { %v1541_v4 = vadd.f32 1e-12, %v1539_v1  ;;  %v1538_v7 = vmul.f32 0.03125, %v1534_v3 }
 0xa58   :  { %4511 = vrsqrt.f32 %v1541_v4  ;;  %v1540_v14 = vadd.f32 1e-12, %v1538_v7 }
 0xa5a   :  { %4513 = vrsqrt.f32 %v1540_v14 }
 0xa65   :  { %v4512_v16 = vpop.eup %4511 }
 0xa66   :  { %v1545_v6 = vmul.f32 %v4512_v16, %v1529_v47 }
 0xa67   :  { %v4514_v18 = vpop.eup %4513 }
 0xa68   :  { %v1544_v19 = vmul.f32 %v4514_v18, %v1528_v50  ;;  %v1553_v20 = vmul.f32 %v3818_v17, %v1545_v6 }
 0xa6a   :  { %v1552_v8 = vmul.f32 %v3818_v17, %v1544_v19  ;;  %v1561_v22 = vadd.f32 %v3819_v5, %v1553_v20  ;;  %v3831_v20 = vld [vmem:[%s5524_s0 + $0x38] sm:$0xff] }
 0xa6b   :  { %4280 = vmatprep.subr.mxu1 %v3831_v20 }
 0xa6c   :  { %v5051_v21 = vadd.f32 %v3819_v5, %v1552_v8  ;;  %v3847_v5 = vld [vmem:[%s5526_s8 + $0x38] sm:$0xff]  ;;  %v3830_v8 = vld [vmem:[%s5524_s0 + $0x30] sm:$0xff] }
 0xa6d   :  { %4302 = vmatprep.subr.mxu0 %v3847_v5 }
 0xa6e   :  { %4258 = vmatprep.mubr.msk.f32.mxu1 %vm82_vm0, %v5051_v21 }
 0xa6f   :  { %4259 = vmatmul.mubr.msk.f32.vlgmr.msra.gmra.mxu1 %vm82_vm0, %v1561_v22 }
 0xa70   :  { %4281 = vmatpush3.msra.mxu1 %v3831_v20 }
 0xa71   :  { %4282 = vmatprep.subr.mxu1 %v3830_v8 }
 0xa72   :  { %4283 = vmatpush3.msra.mxu1 %v3830_v8 }
 0xb2f   :  { %v4260_v27 = vpop.f32.mrf.mxu1 }
 0xb30   :  { %v1651_v28 = vadd.f32 %v4260_v27, %v3820_v26 }
 0xb31   :  { %v1645_v29 = vpop.f32.mrf.mxu1 }
 0xb32   :  { %v1657_v30 = vmul.f32 0.044715, %v1651_v28  ;;  %v1646_v31 = vadd.f32 %v3820_v26, %v1645_v29  ;;  %v1655_v47 = vmul.f32 0.5, %v1651_v28  ;;  %v3826_v29 = vld [vmem:[%s5499_s18] ss:$0 sm:$0xff] }
 0xb34   :  { %v1659_v2 = vmul.f32 %v1657_v30, %v1651_v28  ;;  %v1656_v32 = vmul.f32 0.044715, %v1646_v31  ;;  %v1654_v45 = vmul.f32 0.5, %v1646_v31 }
 0xb36   :  { %v1661_v33 = vmul.f32 %v1659_v2, %v1651_v28  ;;  %v1658_v34 = vmul.f32 %v1656_v32, %v1646_v31 }
 0xb38   :  { %v1663_v36 = vadd.f32 %v1661_v33, %v1651_v28  ;;  %v1660_v37 = vmul.f32 %v1658_v34, %v1646_v31  ;;  %v3827_v33 = vld [vmem:[%s5500_s19] ss:$0 sm:$0xff] }
 0xb3a   :  { %v1665_v57 = vmul.f32 0.7978846, %v1663_v36  ;;  %v1662_v54 = vadd.f32 %v1660_v37, %v1646_v31 }
 0xb3c   :  { %4515 = vtanh.f32 %v1665_v57  ;;  %v1664_v39 = vmul.f32 0.7978846, %v1662_v54  ;;  %v3838_v57 = vld [vmem:[%s5525_s3 + $0x30] sm:$0xff]  ;;  %v3837_v54 = vld [vmem:[%s5525_s3 + $0x28] sm:$0xff] }
 0xb3e   :  { %4517 = vtanh.f32 %v1664_v39  ;;  %v3836_v39 = vld [vmem:[%s5525_s3 + $0x20] sm:$0xff] }
 0xb49   :  { %v4516_v40 = vpop.eup %4515 }
 0xb4a   :  { %v1669_v44 = vadd.f32 1.0, %v4516_v40  ;;  %v3849_v40 = vld [vmem:[%s5490_s9 + $0x1] ss:$0 sm:$0xff] }
 0xb4b   :  { %v4518_v41 = vpop.eup %4517 }
 0xb4c   :  { %v1668_v46 = vadd.f32 1.0, %v4518_v41  ;;  %v1671_v50 = vmul.f32 %v1669_v44, %v1655_v47 }
 0xb4e   :  { %v1670_v48 = vmul.f32 %v1668_v46, %v1654_v45  ;;  %v3833_v46 = vld [vmem:[%s5529_s5 + $0x1] ss:$0 sm:$0xff] }
 0xb50   :  { %4277 = vmatprep.mubr.msk.f32.mxu0 %vm1687_vm12, %v1670_v48 }
 0xb51   :  { %4278 = vmatmul.mubr.msk.f32.vlgmr.msra.gmra.mxu0 %vm1687_vm12, %v1671_v50 }
 0xb52   :  { %4303 = vmatpush3.msra.mxu0 %v3847_v5 }
 0xc11   :  { %v4279_v52 = vpop.f32.mrf.mxu0 }
 0xc12   :  { %v1766_v58 = vadd.f32 %v4279_v52, %v3823_v51 }
 0xc13   :  { %v1760_v38 = vpop.f32.mrf.mxu0 }
 0xc14   :  { %v1761_v35 = vadd.f32 %v3823_v51, %v1760_v38  ;;  %v1770_v59 = vadd.f32 %v1766_v58, %v1561_v22  ;;  %v3829_v22 = vld [vmem:[%s5524_s0 + $0x28] sm:$0xff]  ;;  %v3841_v38 = vld [vmem:[%s5530_s28 + $0x1] ss:$0 sm:$0xff] }
 0xc15   :  { %4284 = vmatprep.subr.mxu1 %v3829_v22 }
 0xc16   :  { %v1776_v60 = vsel %vm82_vm0, %v1770_v59, 0.0  ;;  %v1769_v62 = vadd.f32 %v1761_v35, %v5051_v21  ;;  %v3846_v21 = vld [vmem:[%s5526_s8 + $0x30] sm:$0xff]  ;;  %4285 = vmatpush3.msra.mxu1 %v3829_v22 }
 0xc17   :  { %1777 = vadd.xlane.f32.xlu1 %v1776_v60  ;;  %4304 = vmatprep.subr.mxu0 %v3846_v21 }
 0xc18   :  { %v1773_v0 = vsel %vm82_vm0, %v1769_v62, 0.0  ;;  %4305 = vmatpush3.msra.mxu0 %v3846_v21  ;;  %4286 = vmatprep.subr.mxu1 %v3828_v24 }
 0xc19   :  { %1774 = vadd.xlane.f32.xlu0 %v1773_v0  ;;  %4306 = vmatprep.subr.mxu0 %v3845_v23 }
 0xc1a   :  { %4307 = vmatpush3.msra.mxu0 %v3845_v23  ;;  %4287 = vmatpush3.msra.mxu1 %v3828_v24 }
 0xc1b   :  { %4308 = vmatprep.subr.mxu0 %v3844_v25  ;;  %4291 = vmatprep.subr.mxu1 %v3839_v9 }
 0xc1c   :  { %4309 = vmatpush3.msra.mxu0 %v3844_v25 }
 0xca0   :  { %v1778_v1 = vpop.xlane.xlu1 %1777 }
 0xca1   :  { %v1780_v3 = vmul.f32 0.03125, %v1778_v1 }
 0xca2   :  { %v1775_v4 = vpop.xlane.xlu0 %1774 }
 0xca3   :  { %v1782_v7 = vsub.f32 %v1770_v59, %v1780_v3  ;;  %v1779_v14 = vmul.f32 0.03125, %v1775_v4 }
 0xca5   :  { %v1781_v16 = vsub.f32 %v1769_v62, %v1779_v14  ;;  %v1784_v17 = vmul.f32 %v1782_v7, %v1782_v7 }
 0xca7   :  { %v1788_v6 = vsel %vm82_vm0, %v1784_v17, 0.0  ;;  %v1783_v18 = vmul.f32 %v1781_v16, %v1781_v16 }
 0xca8   :  { %1789 = vadd.xlane.f32.xlu1 %v1788_v6  ;;  %v5217_v6 = vld [vmem:[%s5491_s10 + $0x30] sm:$0xff] }
 0xca9   :  { %v1785_v19 = vsel %vm82_vm0, %v1783_v18, 0.0  ;;  %v5224_v18 = vld [vmem:[%s5491_s10 + $0x28] sm:$0xff] }
 0xcaa   :  { %1786 = vadd.xlane.f32.xlu0 %v1785_v19  ;;  %v5231_v19 = vld [vmem:[%s5491_s10 + $0x20] sm:$0xff] }
 0xd31   :  { %v1790_v49 = vpop.xlane.xlu1 %1789 }
 0xd32   :  { %v1792_v63 = vmul.f32 0.03125, %v1790_v49 }
 0xd33   :  { %v1787_v10 = vpop.xlane.xlu0 %1786 }
 0xd34   :  { %v1794_v53 = vadd.f32 1e-12, %v1792_v63  ;;  %v1791_v26 = vmul.f32 0.03125, %v1787_v10 }
 0xd36   :  { %4519 = vrsqrt.f32 %v1794_v53  ;;  %v1793_v27 = vadd.f32 1e-12, %v1791_v26 }
 0xd38   :  { %4521 = vrsqrt.f32 %v1793_v27 }
 0xd43   :  { %v4520_v28 = vpop.eup %4519 }
 0xd44   :  { %v1798_v30 = vmul.f32 %v4520_v28, %v1782_v7 }
 0xd45   :  { %v4522_v31 = vpop.eup %4521 }
 0xd46   :  { %v1797_v2 = vmul.f32 %v4522_v31, %v1781_v16  ;;  %v1806_v32 = vmul.f32 %v3826_v29, %v1798_v30 }
 0xd48   :  { %v1805_v34 = vmul.f32 %v3826_v29, %v1797_v2  ;;  %v5128_v37 = vadd.f32 %v3827_v33, %v1806_v32 }
 0xd4a   :  { %v5126_v36 = vadd.f32 %v3827_v33, %v1805_v34 }
 0xd4c   :  { %4288 = vmatprep.mubr.msk.f32.mxu1 %vm82_vm0, %v5126_v36  ;;  %4310 = vmatprep.mubr.msk.f32.mxu0 %vm82_vm0, %v5126_v36 }
 0xd4d   :  { %4289 = vmatmul.mubr.msk.f32.vlgmr.msra.gmra.mxu1 %vm82_vm0, %v5128_v37  ;;  %4311 = vmatmul.mubr.msk.f32.vlgmr.msra.gmra.mxu0 %vm82_vm0, %v5128_v37 }
 0xd4e   :  { %4292 = vmatpush3.msra.mxu1 %v3839_v9  ;;  %4299 = vmatprep.mubr.msk.f32.mxu1 %vm82_vm0, %v5126_v36 }
 0xd4f   :  { %4293 = vmatprep.subr.mxu1 %v3838_v57 }
 0xd50   :  { %4294 = vmatpush3.msra.mxu1 %v3838_v57 }
 0xd51   :  { %4295 = vmatprep.subr.mxu1 %v3837_v54 }
 0xd52   :  { %4296 = vmatpush3.msra.mxu1 %v3837_v54 }
 0xd53   :  { %4297 = vmatprep.subr.mxu1 %v3836_v39 }
 0xd54   :  { %4298 = vmatpush3.msra.mxu1 %v3836_v39 }
 0xd55   :  { %4300 = vmatmul.mubr.msk.f32.vlgmr.msra.gmra.mxu1 %vm82_vm0, %v5128_v37 }
 0xe0d   :  { %v4290_v41 = vpop.f32.mrf.mxu1  ;;  %v4312_v44 = vpop.f32.mrf.mxu0 }
 0xe0e   :  { %v5154_v45 = vadd.f32 %v4312_v44, %v3849_v40  ;;  %v1906_v0 = vadd.f32 %v4290_v41, %v3833_v46 }
 0xe0f   :  { %v1900_v47 = vpop.f32.mrf.mxu1  ;;  %v2076_v48 = vpop.f32.mrf.mxu0 }
 0xe10   :  { %v1901_v50 = vadd.f32 %v3833_v46, %v1900_v47  ;;  %v5159_v51 = vadd.f32 %v3849_v40, %v2076_v48  ;;  %v2204_v52 = vmul.f32 %v4818_v56, %v5154_v45  ;;  %v5174_v62 = vmul.f32 %v4830_v61, %v5154_v45 }
 0xe11   :  { %v5186_v7 = vmul.f32 0.35355338, %v1906_v0  ;;  %v5238_v20 = vmul.f32 %v4891_v11, %v5154_v45 }
 0xe12   :  { %4320 = vmatprep.subr.mxu0 %v2204_v52  ;;  %v5163_v58 = vmul.f32 0.35355338, %v1901_v50  ;;  %v2203_v35 = vmul.f32 %v4818_v56, %v5159_v51 }
 0xe13   :  { %4321 = vmatpush3.msra.mxu0 %v2204_v52  ;;  %v2093_v14 = vmul.f32 %v4818_v56, %v5186_v7  ;;  %v2287_v17 = vmul.f32 %v4830_v61, %v5186_v7 }
 0xe14   :  { %4322 = vmatprep.subr.mxu0 %v2203_v35  ;;  %v2092_v60 = vmul.f32 %v4818_v56, %v5163_v58  ;;  %v2286_v16 = vmul.f32 %v4830_v61, %v5163_v58  ;;  %v5207_v56 = vld [vmem:[%s5491_s10 + $0x38] sm:$0xff] }
 0xe15   :  { %v4301_v59 = vpop.f32.mrf.mxu1  ;;  %4323 = vmatpush3.msra.mxu0 %v2203_v35 }
 0xe16   :  { %v5176_v1 = vadd.f32 %v4301_v59, %v3841_v38  ;;  %4317 = vmatprep.mubr.msk.f32.mxu1 %vm82_vm0, %v2092_v60  ;;  %4334 = vmatprep.subr.mxu0 %v5174_v62 }
 0xe17   :  { %v1988_v3 = vpop.f32.mrf.mxu1 }
 0xe18   :  { %v5180_v4 = vadd.f32 %v3841_v38, %v1988_v3  ;;  %4313 = vmatprep.subr.msk.mxu1 %vm82_vm0, %v5176_v1  ;;  %v2391_v3 = vmul.f32 %v4830_v61, %v5159_v51 }
 0xe19   :  { %4314 = vmatpush3.xpose.msk.msra.mxu1 %vm82_vm0, %v5176_v1 }
 0xe1a   :  { %4315 = vmatprep.subr.msk.mxu1 %vm82_vm0, %v5180_v4 }
 0xe1d   :  { %4316 = vmatpush3.xpose.msk.msra.mxu1 %vm82_vm0, %v5180_v4 }
 0xe1e   :  { %4327 = vmatprep.subr.msk.mxu1 %vm82_vm0, %v5176_v1 }
 0xe20   :  { %4318 = vmatmul.mubr.msk.f32.vlgmr.msra.gmra.mxu1 %vm82_vm0, %v2093_v14 }
 0xe21   :  { %4328 = vmatpush3.xpose.msk.msra.mxu1 %vm82_vm0, %v5176_v1  ;;  %4331 = vmatprep.mubr.msk.f32.mxu1 %vm82_vm0, %v2286_v16 }
 0xe22   :  { %4329 = vmatprep.subr.msk.mxu1 %vm82_vm0, %v5180_v4 }
 0xe25   :  { %4330 = vmatpush3.xpose.msk.msra.mxu1 %vm82_vm0, %v5180_v4 }
 0xe26   :  { %4352 = vmatprep.subr.mxu1 %v5207_v56 }
 0xe28   :  { %4332 = vmatmul.mubr.msk.f32.vlgmr.msra.gmra.mxu1 %vm82_vm0, %v2287_v17 }
 0xe29   :  { %4353 = vmatpush3.msra.mxu1 %v5207_v56 }
 0xe2a   :  { %4354 = vmatprep.subr.mxu1 %v5217_v6 }
 0xe2b   :  { %4355 = vmatpush3.msra.mxu1 %v5217_v6 }
 0xe2c   :  { %4356 = vmatprep.subr.mxu1 %v5224_v18 }
 0xe2d   :  { %4357 = vmatpush3.msra.mxu1 %v5224_v18 }
 0xe2e   :  { %4358 = vmatprep.subr.mxu1 %v5231_v19 }
 0xe2f   :  { %4359 = vmatpush3.msra.mxu1 %v5231_v19 }
 0xe30   :  { %4370 = vmatprep.subr.mxu1 %v5238_v20 }
 0xee0   :  { %v4319_v5 = vpop.f32.mrf.mxu1 }
 0xee1   :  { %v2178_v8 = vadd.f32 %v4319_v5, %v4904_v13 }
 0xee2   :  { %v2172_v21 = vpop.f32.mrf.mxu1 }
 0xee3   :  { %v2173_v22 = vadd.f32 %v2172_v21, %v4909_v15  ;;  %v2184_v23 = vsel %vm509_vm8, %v2178_v8, -inf }
 0xee4   :  { %2185 = vmax.xlane.f32.xlu1 %v2184_v23  ;;  %v2636_v23 = vmul.f32 %v4891_v11, %v5163_v58 }
 0xee5   :  { %v2181_v24 = vsel %vm509_vm8, %v2173_v22, -inf }
 0xee6   :  { %2182 = vmax.xlane.f32.xlu0 %v2181_v24  ;;  %v2907_v24 = vmul.f32 %v4960_v12, %v5163_v58 }
 0xee8   :  { %v4333_v25 = vpop.f32.mrf.mxu1 }
 0xee9   :  { %v2366_v9 = vadd.f32 %v4333_v25, %v4904_v13 }
 0xeea   :  { %v2360_v49 = vpop.f32.mrf.mxu1 }
 0xeeb   :  { %v2361_v63 = vadd.f32 %v2360_v49, %v4909_v15  ;;  %v2372_v10 = vsel %vm509_vm8, %v2366_v9, -inf }
 0xeec   :  { %2373 = vmax.xlane.f32.xlu1 %v2372_v10  ;;  %v4574_v10 = vld [vmem:[%s5531_s29] sm:$0xff] }
 0xeed   :  { %v2369_v53 = vsel %vm509_vm8, %v2361_v63, -inf }
 0xeee   :  { %2370 = vmax.xlane.f32.xlu0 %v2369_v53 }
 0xf6d   :  { %v2186_v26 = vpop.xlane.xlu1 %2185 }
 0xf6e   :  { %v2188_v27 = vsub.f32 %v2178_v8, %v2186_v26  ;;  %v2741_v8 = vmul.f32 %v4891_v11, %v5159_v51 }
 0xf6f   :  { %v2183_v28 = vpop.xlane.xlu0 %2182 }
 0xf70   :  { %v2191_v29 = vmul.f32 1.442695, %v2188_v27  ;;  %v2187_v30 = vsub.f32 %v2173_v22, %v2183_v28 }
 0xf72   :  { %4523 = vpow2.f32 %v2191_v29  ;;  %v2189_v31 = vmul.f32 1.442695, %v2187_v30 }
 0xf74   :  { %4525 = vpow2.f32 %v2189_v31 }
 0xf75   :  { %v2374_v2 = vpop.xlane.xlu1 %2373 }
 0xf76   :  { %v2376_v32 = vsub.f32 %v2366_v9, %v2374_v2  ;;  %v4573_v9 = vld [vmem:[%s5531_s29 + $0x8] sm:$0xff] }
 0xf77   :  { %v2371_v13 = vpop.xlane.xlu0 %2370 }
 0xf78   :  { %v2379_v33 = vmul.f32 1.442695, %v2376_v32  ;;  %v2375_v34 = vsub.f32 %v2361_v63, %v2371_v13 }
 0xf7a   :  { %4527 = vpow2.f32 %v2379_v33  ;;  %v2377_v15 = vmul.f32 1.442695, %v2375_v34 }
 0xf7c   :  { %4529 = vpow2.f32 %v2377_v15 }
 0xf7f   :  { %v4524_v57 = vpop.eup %4523 }
 0xf80   :  { %v2196_v54 = vsel %vm509_vm8, %v4524_v57, 0.0 }
 0xf81   :  { %v4526_v39 = vpop.eup %4525  ;;  %2197 = vadd.xlane.f32.xlu1 %v2196_v54 }
 0xf82   :  { %v2193_v40 = vsel %vm509_vm8, %v4526_v39, 0.0 }
 0xf83   :  { %2194 = vadd.xlane.f32.xlu0 %v2193_v40 }
 0xf87   :  { %v4528_v41 = vpop.eup %4527 }
 0xf88   :  { %v2384_v44 = vsel %vm509_vm8, %v4528_v41, 0.0 }
 0xf89   :  { %v4530_v46 = vpop.eup %4529  ;;  %2385 = vadd.xlane.f32.xlu1 %v2384_v44 }
 0xf8a   :  { %v2381_v47 = vsel %vm509_vm8, %v4530_v46, 0.0 }
 0xf8b   :  { %2382 = vadd.xlane.f32.xlu0 %v2381_v47 }
0x100a   :  { %v2198_v48 = vpop.xlane.xlu1 %2197 }
0x100b   :  { %4531 = vrcp.f32 %v2198_v48 }
0x100c   :  { %v2195_v50 = vpop.xlane.xlu0 %2194 }
0x100d   :  { %4533 = vrcp.f32 %v2195_v50 }
0x1012   :  { %v2386_v52 = vpop.xlane.xlu1 %2385 }
0x1013   :  { %4535 = vrcp.f32 %v2386_v52 }
0x1014   :  { %v2383_v38 = vpop.xlane.xlu0 %2382 }
0x1015   :  { %4537 = vrcp.f32 %v2383_v38 }
0x1018   :  { %v4532_v35 = vpop.eup %4531 }
0x1019   :  { %v2202_v0 = vmul.f32 %v4532_v35, %v4524_v57 }
0x101a   :  { %v4534_v59 = vpop.eup %4533 }
0x101b   :  { %v2201_v60 = vmul.f32 %v4534_v59, %v4526_v39 }
0x101d   :  { %4324 = vmatprep.mubr.msk.f32.mxu0 %vm509_vm8, %v2201_v60 }
0x101e   :  { %4325 = vmatmul.mubr.msk.f32.vlgmr.msra.gmra.mxu0 %vm509_vm8, %v2202_v0 }
0x101f   :  { %4335 = vmatpush3.msra.mxu0 %v5174_v62 }
0x1020   :  { %4336 = vmatprep.subr.mxu0 %v2391_v3  ;;  %v4536_v14 = vpop.eup %4535 }
0x1021   :  { %4337 = vmatpush3.msra.mxu0 %v2391_v3  ;;  %v2390_v5 = vmul.f32 %v4536_v14, %v4528_v41 }
0x1022   :  { %v4538_v16 = vpop.eup %4537  ;;  %4341 = vmatprep.subr.mxu0 %v5207_v56 }
0x1023   :  { %v2389_v17 = vmul.f32 %v4538_v16, %v4530_v46 }
0x1025   :  { %4338 = vmatprep.mubr.msk.f32.mxu0 %vm509_vm8, %v2389_v17 }
0x1026   :  { %4339 = vmatmul.mubr.msk.f32.vlgmr.msra.gmra.mxu0 %vm509_vm8, %v2390_v5 }
0x1027   :  { %4342 = vmatpush3.msra.mxu0 %v5207_v56 }
0x1028   :  { %4343 = vmatprep.subr.mxu0 %v5217_v6 }
0x1029   :  { %4344 = vmatpush3.msra.mxu0 %v5217_v6 }
0x102a   :  { %4345 = vmatprep.subr.mxu0 %v5224_v18 }
0x102b   :  { %4346 = vmatpush3.msra.mxu0 %v5224_v18 }
0x102c   :  { %4347 = vmatprep.subr.mxu0 %v5231_v19 }
0x102d   :  { %4348 = vmatpush3.msra.mxu0 %v5231_v19 }
0x102e   :  { %4363 = vmatprep.subr.msk.mxu0 %vm82_vm0, %v5176_v1 }
0x10de   :  { %v4326_v61 = vpop.f32.mrf.mxu0 }
0x10e0   :  { %v2277_v62 = vpop.f32.mrf.mxu0 }
0x10e1   :  { %4360 = vmatprep.mubr.msk.f32.mxu1 %vm82_vm0, %v2277_v62 }
0x10e2   :  { %4361 = vmatmul.mubr.msk.f32.vlgmr.msra.gmra.mxu1 %vm82_vm0, %v4326_v61 }
0x10e3   :  { %4371 = vmatpush3.msra.mxu1 %v5238_v20  ;;  %v2637_v20 = vmul.f32 %v4891_v11, %v5186_v7  ;;  %v2908_v11 = vmul.f32 %v4960_v12, %v5186_v7 }
0x10e4   :  { %4372 = vmatprep.subr.mxu1 %v2741_v8 }
0x10e5   :  { %4373 = vmatpush3.msra.mxu1 %v2741_v8 }
0x10e6   :  { %v4340_v21 = vpop.f32.mrf.mxu0  ;;  %4377 = vmatprep.subr.mxu1 %v5207_v56 }
0x10e8   :  { %v2465_v22 = vpop.f32.mrf.mxu0 }
0x10e9   :  { %4349 = vmatprep.mubr.msk.f32.mxu0 %vm82_vm0, %v2465_v22 }
0x10ea   :  { %4350 = vmatmul.mubr.msk.f32.vlgmr.msra.gmra.mxu0 %vm82_vm0, %v4340_v21 }
0x10eb   :  { %4364 = vmatpush3.xpose.msk.msra.mxu0 %vm82_vm0, %v5176_v1  ;;  %4367 = vmatprep.mubr.msk.f32.mxu0 %vm82_vm0, %v2636_v23 }
0x10ec   :  { %4365 = vmatprep.subr.msk.mxu0 %vm82_vm0, %v5180_v4 }
0x10ef   :  { %4366 = vmatpush3.xpose.msk.msra.mxu0 %vm82_vm0, %v5180_v4 }
0x10f0   :  { %4388 = vmatprep.subr.msk.mxu0 %vm82_vm0, %v5176_v1 }
0x10f2   :  { %4368 = vmatmul.mubr.msk.f32.vlgmr.msra.gmra.mxu0 %vm82_vm0, %v2637_v20 }
0x10f3   :  { %4389 = vmatpush3.xpose.msk.msra.mxu0 %vm82_vm0, %v5176_v1  ;;  %4392 = vmatprep.mubr.msk.f32.mxu0 %vm82_vm0, %v2907_v24 }
0x10f4   :  { %4390 = vmatprep.subr.msk.mxu0 %vm82_vm0, %v5180_v4 }
0x10f7   :  { %4391 = vmatpush3.xpose.msk.msra.mxu0 %vm82_vm0, %v5180_v4 }
0x10f8   :  { %4402 = vmatprep.subr.mxu0 %v5207_v56 }
0x10fa   :  { %4393 = vmatmul.mubr.msk.f32.vlgmr.msra.gmra.mxu0 %vm82_vm0, %v2908_v11 }
0x10fb   :  { %4403 = vmatpush3.msra.mxu0 %v5207_v56 }
0x10fc   :  { %4404 = vmatprep.subr.mxu0 %v5217_v6 }
0x10fd   :  { %4405 = vmatpush3.msra.mxu0 %v5217_v6 }
0x10fe   :  { %4406 = vmatprep.subr.mxu0 %v5224_v18 }
0x10ff   :  { %4407 = vmatpush3.msra.mxu0 %v5224_v18 }
0x1100   :  { %4408 = vmatprep.subr.mxu0 %v5231_v19 }
0x1101   :  { %4409 = vmatpush3.msra.mxu0 %v5231_v19 }
0x11a2   :  { %v4362_v58 = vpop.f32.mrf.mxu1 }
0x11a4   :  { %v2627_v8 = vpop.f32.mrf.mxu1 }
0x11aa   :  { %v4351_v1 = vpop.f32.mrf.mxu0 }
0x11ab   :  { %v5313_v4 = vadd.f32 %v4362_v58, %v4351_v1 }
0x11ac   :  { %v5315_v7 = vpop.f32.mrf.mxu0 }
0x11ad   :  { %v2628_v11 = vadd.f32 %v2627_v8, %v5315_v7  ;;  %v3904_v8 = vld [vmem:[%s5497_s16 + $0x50] sm:$0xff] }
0x11b2   :  { %v4369_v25 = vpop.f32.mrf.mxu0 }
0x11b3   :  { %v2716_v49 = vadd.f32 %v4573_v9, %v4369_v25 }
0x11b4   :  { %v2710_v63 = vpop.f32.mrf.mxu0 }
0x11b5   :  { %v2711_v53 = vadd.f32 %v4574_v10, %v2710_v63  ;;  %v2722_v26 = vsel %vm509_vm8, %v2716_v49, -inf }
0x11b6   :  { %2723 = vmax.xlane.f32.xlu1 %v2722_v26 }
0x11b7   :  { %v2719_v27 = vsel %vm509_vm8, %v2711_v53, -inf }
0x11b8   :  { %2720 = vmax.xlane.f32.xlu0 %v2719_v27 }
0x11ba   :  { %v4394_v13 = vpop.f32.mrf.mxu0 }
0x11bb   :  { %v2987_v15 = vadd.f32 %v4573_v9, %v4394_v13 }
0x11bc   :  { %v2981_v34 = vpop.f32.mrf.mxu0 }
0x11bd   :  { %v2982_v39 = vadd.f32 %v4574_v10, %v2981_v34  ;;  %v2993_v41 = vsel %vm509_vm8, %v2987_v15, -inf }
0x11bf   :  { %v2990_v44 = vsel %vm509_vm8, %v2982_v39, -inf }
0x123f   :  { %v2724_v28 = vpop.xlane.xlu1 %2723 }
0x1240   :  { %v2726_v29 = vsub.f32 %v2716_v49, %v2724_v28 }
0x1241   :  { %v2721_v30 = vpop.xlane.xlu0 %2720 }
0x1242   :  { %v2729_v31 = vmul.f32 1.442695, %v2726_v29  ;;  %v2725_v2 = vsub.f32 %v2711_v53, %v2721_v30 }
0x1244   :  { %4539 = vpow2.f32 %v2729_v31  ;;  %v2727_v32 = vmul.f32 1.442695, %v2725_v2 }
0x1246   :  { %4541 = vpow2.f32 %v2727_v32 }
0x1251   :  { %v4540_v33 = vpop.eup %4539 }
0x1252   :  { %v2734_v57 = vsel %vm509_vm8, %v4540_v33, 0.0 }
0x1253   :  { %v4542_v54 = vpop.eup %4541  ;;  %2735 = vadd.xlane.f32.xlu1 %v2734_v57 }
0x1254   :  { %v2731_v40 = vsel %vm509_vm8, %v4542_v54, 0.0 }
0x1255   :  { %2732 = vadd.xlane.f32.xlu0 %v2731_v40  ;;  %v3894_v40 = vld [vmem:[%s5495_s14 + $0x20] sm:$0xff] }
0x1257   :  { %2994 = vmax.xlane.f32.xlu1 %v2993_v41 }
0x1259   :  { %2991 = vmax.xlane.f32.xlu0 %v2990_v44 }
0x12dc   :  { %v2736_v46 = vpop.xlane.xlu1 %2735 }
0x12dd   :  { %4543 = vrcp.f32 %v2736_v46 }
0x12de   :  { %v2733_v47 = vpop.xlane.xlu0 %2732 }
0x12df   :  { %4545 = vrcp.f32 %v2733_v47 }
0x12e0   :  { %v2995_v48 = vpop.xlane.xlu1 %2994 }
0x12e1   :  { %v2997_v50 = vsub.f32 %v2987_v15, %v2995_v48 }
0x12e2   :  { %v2992_v52 = vpop.xlane.xlu0 %2991 }
0x12e3   :  { %v3000_v38 = vmul.f32 1.442695, %v2997_v50  ;;  %v2996_v35 = vsub.f32 %v2982_v39, %v2992_v52  ;;  %v3895_v39 = vld [vmem:[%s5495_s14 + $0x28] sm:$0xff] }
0x12e5   :  { %4547 = vpow2.f32 %v3000_v38  ;;  %v2998_v59 = vmul.f32 1.442695, %v2996_v35  ;;  %v3892_v38 = vld [vmem:[%s5493_s12 + $0x1] ss:$0 sm:$0xff] }
0x12e7   :  { %4549 = vpow2.f32 %v2998_v59 }
0x12ea   :  { %v4544_v60 = vpop.eup %4543 }
0x12eb   :  { %v2740_v14 = vmul.f32 %v4544_v60, %v4540_v33 }
0x12ec   :  { %v4546_v0 = vpop.eup %4545 }
0x12ed   :  { %v2739_v3 = vmul.f32 %v4546_v0, %v4542_v54  ;;  %v3896_v54 = vld [vmem:[%s5495_s14 + $0x30] sm:$0xff] }
0x12ef   :  { %4374 = vmatprep.mubr.msk.f32.mxu1 %vm509_vm8, %v2739_v3  ;;  %v3893_v3 = vld [vmem:[%s5494_s13 + $0x1] ss:$0 sm:$0xff] }
0x12f0   :  { %4375 = vmatmul.mubr.msk.f32.vlgmr.msra.gmra.mxu1 %vm509_vm8, %v2740_v14 }
0x12f1   :  { %4378 = vmatpush3.msra.mxu1 %v5207_v56  ;;  %v3013_v56 = vmul.f32 %v4960_v12, %v5154_v45  ;;  %v3012_v45 = vmul.f32 %v4960_v12, %v5159_v51  ;;  %v3889_v51 = vld [vmem:[%s5492_s11 + $0x1] ss:$0 sm:$0xff] }
0x12f2   :  { %v4548_v16 = vpop.eup %4547  ;;  %4379 = vmatprep.subr.mxu1 %v5217_v6 }
0x12f3   :  { %4380 = vmatpush3.msra.mxu1 %v5217_v6  ;;  %v3005_v17 = vsel %vm509_vm8, %v4548_v16, 0.0 }
0x12f4   :  { %v4550_v5 = vpop.eup %4549  ;;  %4381 = vmatprep.subr.mxu1 %v5224_v18  ;;  %3006 = vadd.xlane.f32.xlu1 %v3005_v17 }
0x12f5   :  { %4382 = vmatpush3.msra.mxu1 %v5224_v18  ;;  %v3002_v61 = vsel %vm509_vm8, %v4550_v5, 0.0 }
0x12f6   :  { %4383 = vmatprep.subr.mxu1 %v5231_v19  ;;  %3003 = vadd.xlane.f32.xlu0 %v3002_v61  ;;  %v3908_v61 = vld [vmem:[%s5497_s16 + $0x70] sm:$0xff] }
0x12f7   :  { %4384 = vmatpush3.msra.mxu1 %v5231_v19 }
0x12f8   :  { %4395 = vmatprep.subr.mxu1 %v3013_v56 }
0x137d   :  { %v3007_v62 = vpop.xlane.xlu1 %3006 }
0x137f   :  { %v3004_v6 = vpop.xlane.xlu0 %3003 }
0x1380   :  { %4551 = vrcp.f32 %v3004_v6  ;;  %v3906_v6 = vld [vmem:[%s5497_s16 + $0x60] sm:$0xff] }
0x1381   :  { %4553 = vrcp.f32 %v3007_v62  ;;  %v3905_v62 = vld [vmem:[%s5497_s16 + $0x58] sm:$0xff] }
0x138d   :  { %v4552_v21 = vpop.eup %4551 }
0x138e   :  { %v4554_v18 = vpop.eup %4553  ;;  %v3010_v20 = vmul.f32 %v4552_v21, %v4550_v5  ;;  %v3909_v5 = vld [vmem:[%s5497_s16 + $0x78] sm:$0xff]  ;;  %v3903_v21 = vld [vmem:[%s5497_s16 + $0x48] sm:$0xff] }
0x138f   :  { %v3011_v19 = vmul.f32 %v4554_v18, %v4548_v16  ;;  %4424 = vmatprep.subr.mxu0 %v3909_v5 }
0x13b0   :  { %v4376_v22 = vpop.f32.mrf.mxu1 }
0x13b2   :  { %v2815_v23 = vpop.f32.mrf.mxu1 }
0x13b3   :  { %4385 = vmatprep.mubr.msk.f32.mxu1 %vm82_vm0, %v2815_v23  ;;  %v3899_v23 = vld [vmem:[%s5496_s15 + $0x1] ss:$0 sm:$0xff] }
0x13b4   :  { %4386 = vmatmul.mubr.msk.f32.vlgmr.msra.gmra.mxu1 %vm82_vm0, %v4376_v22  ;;  %v3902_v22 = vld [vmem:[%s5497_s16 + $0x40] sm:$0xff] }
0x13b5   :  { %4396 = vmatpush3.msra.mxu1 %v3013_v56  ;;  %4399 = vmatprep.mubr.msk.f32.mxu1 %vm509_vm8, %v3010_v20  ;;  %v3907_v56 = vld [vmem:[%s5497_s16 + $0x68] sm:$0xff] }
0x13b6   :  { %4397 = vmatprep.subr.mxu1 %v3012_v45 }
0x13b7   :  { %4398 = vmatpush3.msra.mxu1 %v3012_v45 }
0x13b8   :  { %4400 = vmatmul.mubr.msk.f32.vlgmr.msra.gmra.mxu1 %vm509_vm8, %v3011_v19 }
0x1474   :  { %v4387_v24 = vpop.f32.mrf.mxu1 }
0x1475   :  { %v2906_v58 = vadd.f32 %v4387_v24, %v5313_v4 }
0x1476   :  { %v2896_v1 = vpop.f32.mrf.mxu1 }
0x1477   :  { %v2905_v25 = vadd.f32 %v2896_v1, %v2628_v11 }
0x1478   :  { %v4401_v9 = vpop.f32.mrf.mxu1 }
0x147a   :  { %v3086_v49 = vpop.f32.mrf.mxu1 }
0x147b   :  { %4410 = vmatprep.mubr.msk.f32.mxu0 %vm82_vm0, %v3086_v49 }
0x147c   :  { %4411 = vmatmul.mubr.msk.f32.vlgmr.msra.gmra.mxu0 %vm82_vm0, %v4401_v9 }
0x147d   :  { %4425 = vmatpush3.msra.mxu0 %v3909_v5 }
0x147e   :  { %4426 = vmatprep.subr.mxu0 %v3908_v61 }
0x147f   :  { %4427 = vmatpush3.msra.mxu0 %v3908_v61  ;;  %v3917_v61 = vld [vmem:[%s5500_s19 + $0x1] ss:$0 sm:$0xff] }
0x1480   :  { %4428 = vmatprep.subr.mxu0 %v3907_v56 }
0x1481   :  { %4429 = vmatpush3.msra.mxu0 %v3907_v56 }
0x1482   :  { %4430 = vmatprep.subr.mxu0 %v3906_v6 }
0x1483   :  { %4431 = vmatpush3.msra.mxu0 %v3906_v6 }
0x1484   :  { %4432 = vmatprep.subr.mxu0 %v3905_v62 }
0x1485   :  { %4433 = vmatpush3.msra.mxu0 %v3905_v62 }
0x1486   :  { %4434 = vmatprep.subr.mxu0 %v3904_v8 }
0x1487   :  { %4435 = vmatpush3.msra.mxu0 %v3904_v8 }
0x1488   :  { %4436 = vmatprep.subr.mxu0 %v3903_v21 }
0x1489   :  { %4437 = vmatpush3.msra.mxu0 %v3903_v21 }
0x148a   :  { %4438 = vmatprep.subr.mxu0 %v3902_v22 }
0x148b   :  { %4439 = vmatpush3.msra.mxu0 %v3902_v22  ;;  %v3576_v22 = vld [vmem:[%s5501_s20 + $0x18] sm:$0xff] }
0x153c   :  { %v4412_v12 = vpop.f32.mrf.mxu0 }
0x153d   :  { %v3177_v63 = vadd.f32 %v4412_v12, %v2906_v58 }
0x153e   :  { %v3167_v10 = vpop.f32.mrf.mxu0 }
0x153f   :  { %v3187_v53 = vadd.f32 %v3889_v51, %v3177_v63  ;;  %v3176_v26 = vadd.f32 %v3167_v10, %v2905_v25 }
0x1541   :  { %v3186_v7 = vadd.f32 %v3889_v51, %v3176_v26  ;;  %v3189_v4 = vadd.f32 %v3187_v53, %v5128_v37 }
0x1543   :  { %v3197_v27 = vsel %vm82_vm0, %v3189_v4, 0.0  ;;  %v3188_v28 = vadd.f32 %v3186_v7, %v5126_v36  ;;  %v3897_v36 = vld [vmem:[%s5495_s14 + $0x38] sm:$0xff] }
0x1544   :  { %3198 = vadd.xlane.f32.xlu1 %v3197_v27  ;;  %4413 = vmatprep.subr.mxu1 %v3897_v36 }
0x1545   :  { %v3194_v29 = vsel %vm82_vm0, %v3188_v28, 0.0  ;;  %4414 = vmatpush3.msra.mxu1 %v3897_v36 }
0x1546   :  { %3195 = vadd.xlane.f32.xlu0 %v3194_v29  ;;  %4415 = vmatprep.subr.mxu1 %v3896_v54 }
0x1547   :  { %4416 = vmatpush3.msra.mxu1 %v3896_v54 }
0x1548   :  { %4417 = vmatprep.subr.mxu1 %v3895_v39 }
0x1549   :  { %4418 = vmatpush3.msra.mxu1 %v3895_v39 }
0x154a   :  { %4419 = vmatprep.subr.mxu1 %v3894_v40 }
0x154b   :  { %4420 = vmatpush3.msra.mxu1 %v3894_v40 }
0x154c   :  { %4443 = vmatprep.subr.mxu1 %v4597_v55 }
0x15cd   :  { %v3199_v30 = vpop.xlane.xlu1 %3198 }
0x15ce   :  { %v3201_v31 = vmul.f32 0.03125, %v3199_v30  ;;  %v3911_v30 = vld [vmem:[%s5498_s17 + $0x1] ss:$0 sm:$0xff] }
0x15cf   :  { %v3196_v2 = vpop.xlane.xlu0 %3195 }
0x15d0   :  { %v3203_v32 = vsub.f32 %v3189_v4, %v3201_v31  ;;  %v3200_v13 = vmul.f32 0.03125, %v3196_v2 }
0x15d2   :  { %v3202_v33 = vsub.f32 %v3188_v28, %v3200_v13  ;;  %v3205_v34 = vmul.f32 %v3203_v32, %v3203_v32 }
0x15d4   :  { %v3209_v15 = vsel %vm82_vm0, %v3205_v34, 0.0  ;;  %v3204_v57 = vmul.f32 %v3202_v33, %v3202_v33 }
0x15d5   :  { %3210 = vadd.xlane.f32.xlu1 %v3209_v15 }
0x15d6   :  { %v3206_v37 = vsel %vm82_vm0, %v3204_v57, 0.0 }
0x15d7   :  { %3207 = vadd.xlane.f32.xlu0 %v3206_v37 }
0x165e   :  { %v3211_v41 = vpop.xlane.xlu1 %3210 }
0x165f   :  { %v3213_v44 = vmul.f32 0.03125, %v3211_v41 }
0x1660   :  { %v3208_v46 = vpop.xlane.xlu0 %3207 }
0x1661   :  { %v3215_v47 = vadd.f32 1e-12, %v3213_v44  ;;  %v3212_v48 = vmul.f32 0.03125, %v3208_v46 }
0x1663   :  { %4555 = vrsqrt.f32 %v3215_v47  ;;  %v3214_v50 = vadd.f32 1e-12, %v3212_v48 }
0x1665   :  { %4557 = vrsqrt.f32 %v3214_v50 }
0x1670   :  { %v4556_v52 = vpop.eup %4555 }
0x1671   :  { %v3219_v35 = vmul.f32 %v4556_v52, %v3203_v32 }
0x1672   :  { %v4558_v59 = vpop.eup %4557 }
0x1673   :  { %v3218_v60 = vmul.f32 %v4558_v59, %v3202_v33  ;;  %v3227_v0 = vmul.f32 %v3892_v38, %v3219_v35 }
0x1675   :  { %v3226_v14 = vmul.f32 %v3892_v38, %v3218_v60  ;;  %v3235_v17 = vadd.f32 %v3893_v3, %v3227_v0  ;;  %v3495_v0 = vshrl.u32 %v128_v42, 7 }
0x1677   :  { %v3234_v16 = vadd.f32 %v3893_v3, %v3226_v14  ;;  %v3916_v14 = vld [vmem:[%s5499_s18 + $0x1] ss:$0 sm:$0xff] }
0x1679   :  { %4421 = vmatprep.mubr.msk.f32.mxu1 %vm82_vm0, %v3234_v16 }
0x167a   :  { %4422 = vmatmul.mubr.msk.f32.vlgmr.msra.gmra.mxu1 %vm82_vm0, %v3235_v17 }
0x167b   :  { %4447 = vmatprep.mubr.msk.f32.mxu1 %vm4598_vm13, %v4597_v55 }
0x173a   :  { %v4423_v18 = vpop.f32.mrf.mxu1 }
0x173b   :  { %v3327_v20 = vadd.f32 %v4423_v18, %v3899_v23  ;;  %v3573_v18 = vld [vmem:[%s5501_s20] sm:$0xff] }
0x173c   :  { %v3321_v45 = vpop.f32.mrf.mxu1 }
0x173d   :  { %v3333_v19 = vmul.f32 0.044715, %v3327_v20  ;;  %v3322_v24 = vadd.f32 %v3899_v23, %v3321_v45  ;;  %v3331_v27 = vmul.f32 0.5, %v3327_v20  ;;  %v3574_v23 = vld [vmem:[%s5501_s20 + $0x8] sm:$0xff] }
0x173f   :  { %v3335_v11 = vmul.f32 %v3333_v19, %v3327_v20  ;;  %v3332_v58 = vmul.f32 0.044715, %v3322_v24  ;;  %v3330_v7 = vmul.f32 0.5, %v3322_v24  ;;  %v3661_v19 = vld [vmem:[%s5503_s22 + $0x18] sm:$0xff] }
0x1741   :  { %v3337_v1 = vmul.f32 %v3335_v11, %v3327_v20  ;;  %v3334_v25 = vmul.f32 %v3332_v58, %v3322_v24  ;;  %v3659_v11 = vld [vmem:[%s5503_s22 + $0x8] sm:$0xff]  ;;  %v3658_v58 = vld [vmem:[%s5503_s22] sm:$0xff] }
0x1743   :  { %v3339_v9 = vadd.f32 %v3337_v1, %v3327_v20  ;;  %v3336_v49 = vmul.f32 %v3334_v25, %v3322_v24  ;;  %v3920_v1 = vld [vmem:[%s5502_s21] ss:$0 sm:$0xff]  ;;  %s4599_s21 = smov [#allocation2]  }
0x1745   :  { %v3341_v12 = vmul.f32 0.7978846, %v3339_v9  ;;  %v3338_v51 = vadd.f32 %v3336_v49, %v3322_v24  ;;  %v3660_v24 = vld [vmem:[%s5503_s22 + $0x10] sm:$0xff]  ;;  %s3762_s22 = sshll.u32 %s4599_s21, 4  ;;  %s3763_s22 = int_to_ptr.vmem [resolvable:$true] %s3762_s22 }
0x1746   :  { %p4580_p1 = scmp.lt.s32.totalorder %s3763_s22, %s3763_s22 }
0x1747   :  { %4559 = vtanh.f32 %v3341_v12  ;;  %v3340_v63 = vmul.f32 0.7978846, %v3338_v51  ;;  %v3922_v51 = vld [vmem:[%s5504_s23] ss:$0 sm:$0xff]  ;;  %s4575_s23 = scalar_lea.vmem %s3763_s22, 32 }
0x1748   :  { %p4576_p0 = scmp.ne.s32.totalorder %s3763_s22, %s4575_s23  ;;  %p4581_p2 = scmp.lt.s32.totalorder %s4575_s23, %s4575_s23 }
0x1749   :  { %4561 = vtanh.f32 %v3340_v63 }
0x174a   :  { %p4582_p3 = por %p4581_p2, %p4580_p1 }
0x174c   :  { %p4583_p4 = pnand %p4582_p3, %p4576_p0 }
0x1754   :  { %v4560_v10 = vpop.eup %4559 }
0x1755   :  { %v3345_v26 = vadd.f32 1.0, %v4560_v10 }
0x1756   :  { %v4562_v53 = vpop.eup %4561 }
0x1757   :  { %v3344_v4 = vadd.f32 1.0, %v4562_v53  ;;  %v3347_v29 = vmul.f32 %v3345_v26, %v3331_v27 }
0x1759   :  { %v3346_v28 = vmul.f32 %v3344_v4, %v3330_v7 }
0x175b   :  { %4440 = vmatprep.mubr.msk.f32.mxu0 %vm1687_vm12, %v3346_v28 }
0x175c   :  { %4441 = vmatmul.mubr.msk.f32.vlgmr.msra.gmra.mxu0 %vm1687_vm12, %v3347_v29 }
0x181c   :  { %v4442_v31 = vpop.f32.mrf.mxu0 }
0x181d   :  { %v3443_v2 = vadd.f32 %v4442_v31, %v3911_v30 }
0x181e   :  { %v3437_v32 = vpop.f32.mrf.mxu0 }
0x181f   :  { %v3438_v13 = vadd.f32 %v3911_v30, %v3437_v32  ;;  %v3447_v33 = vadd.f32 %v3443_v2, %v3235_v17 }
0x1821   :  { %v3455_v34 = vsel %vm82_vm0, %v3447_v33, 0.0  ;;  %v3446_v15 = vadd.f32 %v3438_v13, %v3234_v16  ;;  %v3496_v16 = vmul.u32 8, %v3495_v0 }
0x1822   :  { %3456 = vadd.xlane.f32.xlu0 %v3455_v34 }
0x1823   :  { %v3452_v57 = vsel %vm82_vm0, %v3446_v15, 0.0  ;;  %vm3497_vm14 = vcmp.eq.s32.totalorder %v4794_v43, %v3496_v16  ;;  %v3575_v43 = vld [vmem:[%s5501_s20 + $0x10] sm:$0xff] }
0x1824   :  { %3453 = vadd.xlane.f32.xlu1 %v3452_v57  ;;  %v3918_v21 = vsel %vm3497_vm14, 1.0, %v4597_v55 }
0x18ab   :  { %v3457_v37 = vpop.xlane.xlu0 %3456 }
0x18ac   :  { %v3459_v36 = vmul.f32 0.03125, %v3457_v37 }
0x18ad   :  { %v3454_v54 = vpop.xlane.xlu1 %3453 }
0x18ae   :  { %v3461_v39 = vsub.f32 %v3447_v33, %v3459_v36  ;;  %v3458_v40 = vmul.f32 0.03125, %v3454_v54 }
0x18b0   :  { %v3460_v41 = vsub.f32 %v3446_v15, %v3458_v40  ;;  %v3463_v44 = vmul.f32 %v3461_v39, %v3461_v39 }
0x18b2   :  { %v3467_v46 = vsel %vm82_vm0, %v3463_v44, 0.0  ;;  %v3462_v47 = vmul.f32 %v3460_v41, %v3460_v41 }
0x18b3   :  { %3468 = vadd.xlane.f32.xlu0 %v3467_v46 }
0x18b4   :  { %v3464_v48 = vsel %vm82_vm0, %v3462_v47, 0.0 }
0x18b5   :  { %3465 = vadd.xlane.f32.xlu1 %v3464_v48 }
0x193c   :  { %v3469_v50 = vpop.xlane.xlu0 %3468 }
0x193d   :  { %v3471_v52 = vmul.f32 0.03125, %v3469_v50 }
0x193e   :  { %v3466_v38 = vpop.xlane.xlu1 %3465 }
0x193f   :  { %v3473_v35 = vadd.f32 1e-12, %v3471_v52  ;;  %v3470_v59 = vmul.f32 0.03125, %v3466_v38 }
0x1941   :  { %4563 = vrsqrt.f32 %v3473_v35  ;;  %v3472_v60 = vadd.f32 1e-12, %v3470_v59 }
0x1943   :  { %4565 = vrsqrt.f32 %v3472_v60 }
0x194e   :  { %v4564_v3 = vpop.eup %4563 }
0x194f   :  { %v3477_v17 = vmul.f32 %v4564_v3, %v3461_v39 }
0x1950   :  { %v4566_v5 = vpop.eup %4565 }
0x1951   :  { %v3485_v56 = vmul.f32 %v3916_v14, %v3477_v17  ;;  %v3476_v6 = vmul.f32 %v4566_v5, %v3460_v41 }
0x1953   :  { %v3493_v62 = vadd.f32 %v3917_v61, %v3485_v56  ;;  %v3484_v8 = vmul.f32 %v3916_v14, %v3476_v6 }
0x1955   :  { %4444 = vmatpush3.msra.mxu1 %v3493_v62  ;;  %v3492_v42 = vadd.f32 %v3917_v61, %v3484_v8 }
0x1956   :  { %4445 = vmatprep.subr.mxu1 %v4597_v55 }
0x1957   :  { %4446 = vmatpush3.msra.mxu1 %v3492_v42 }
0x1958   :  { %4448 = vmatmul.mubr.msk.f32.vlgmr.msra.gmra.mxu1 %vm509_vm8, %v3918_v21  ;;  %4450 = vmatprep.subr.mxu1 %v4597_v55 }
0x1959   :  { %4451 = vmatpush3.msra.mxu1 %v3576_v22  ;;  %4458 = vmatprep.mubr.msk.f32.mxu1 %vm4598_vm13, %v4597_v55 }
0x195a   :  { %4452 = vmatprep.subr.mxu1 %v4597_v55 }
0x195b   :  { %4453 = vmatpush3.msra.mxu1 %v3575_v43 }
0x195c   :  { %4454 = vmatprep.subr.mxu1 %v4597_v55 }
0x195d   :  { %4455 = vmatpush3.msra.mxu1 %v3574_v23 }
0x195e   :  { %4456 = vmatprep.subr.mxu1 %v4597_v55 }
0x195f   :  { %4457 = vmatpush3.msra.mxu1 %v3573_v18 }
0x1960   :  { %4461 = vmatprep.subr.mxu1 %v4597_v55 }
0x1a18   :  { %v3569_v20 = vpop.f32.mrf.mxu1 }
0x1a19   :  { %4459 = vmatmul.mubr.msk.f32.vlgmr.msra.gmra.mxu1 %vm82_vm0, %v3569_v20 }
0x1a1a   :  { %v4449_v45 = vpop.f32.mrf.mxu1  ;;  %4469 = vmatprep.mubr.msk.f32.mxu1 %vm4598_vm13, %v4597_v55  ;;  %4462 = vmatpush3.msra.mxu1 %v3661_v19 }
0x1a1b   :  { %4463 = vmatprep.subr.mxu1 %v4597_v55 }
0x1a1c   :  { %4464 = vmatpush3.msra.mxu1 %v3660_v24 }
0x1a1d   :  { %4465 = vmatprep.subr.mxu1 %v4597_v55 }
0x1a1e   :  { %4466 = vmatpush3.msra.mxu1 %v3659_v11 }
0x1a1f   :  { %4467 = vmatprep.subr.mxu1 %v4597_v55 }
0x1a20   :  { %4468 = vmatpush3.msra.mxu1 %v3658_v58 }
0x1ad9   :  { %v3653_v25 = vpop.f32.mrf.mxu1 }
0x1ada   :  { %v3654_v9 = vadd.f32 %v3920_v1, %v3653_v25 }
0x1adb   :  { %v4460_v49 = vpop.f32.mrf.mxu1 }
0x1adc   :  { %4567 = vtanh.f32 %v3654_v9 }
0x1ae9   :  { %v4568_v12 = vpop.eup %4567 }
0x1aea   :  { %4470 = vmatmul.mubr.msk.f32.vlgmr.msra.gmra.mxu1 %vm82_vm0, %v4568_v12 }
0x1baa   :  { %v3738_v63 = vpop.f32.mrf.mxu1 }
0x1bab   :  { %v3739_v10 = vadd.f32 %v3922_v51, %v3738_v63 }
0x1bac   :  { %v4471_v55 = vpop.f32.mrf.mxu1 }
0x1bad   :  { %v3743_v53 = vsel %vm3742_vm15, %v3739_v10, -inf }
0x1bae   :  { %3744 = vmax.xlane.f32.xlu0 %v3743_v53 }
0x1c37   :  { %v3745_v26 = vpop.xlane.xlu0 %3744 }
0x1c38   :  { %v3746_v7 = vsub.f32 %v3739_v10, %v3745_v26 }
0x1c3a   :  { %v3747_v4 = vmul.f32 1.442695, %v3746_v7 }
0x1c3c   :  { %4569 = vpow2.f32 %v3747_v4 }
0x1c49   :  { %v4570_v27 = vpop.eup %4569 }
0x1c4a   :  { %v3749_v28 = vsel %vm3742_vm15, %v4570_v27, 0.0 }
0x1c4b   :  { %3750 = vadd.xlane.f32.xlu1 %v3749_v28 }
0x1cd4   :  { %v3751_v29 = vpop.xlane.xlu1 %3750 }
0x1cd5   :  { %4571 = vlog2.f32 %v3751_v29 }
0x1ce2   :  { %v4572_v30 = vpop.eup %4571 }
0x1ce3   :  { %v3753_v31 = vmul.f32 0.6931472, %v4572_v30 }
0x1ce5   :  { %v3754_v2 = vsub.f32 %v3746_v7, %v3753_v31 }
0x1ce7   :  { %3755 = vst.msk [vmem:[#allocation2] sm:$0x3] %vm3742_vm15, %v3754_v2 }
0x1ce8   :  { %4586 = shalt.err (!%p4583_p4)
}
0x1ce9   :  { %s5532_s15 = sld [smem:[#allocation14_spill]] }
0x1cef   :  { %3765 = dma.vmem_to_hbm [thread:$0]  %s3763_s22, 32, %s5532_s15, [#allocation3]  }
0x1cf0   :  { %4595 = dma.done.wait [#allocation3], 32  }
0x1cf1   :  { %4596 = vsyncadd [#allocation3], 4294967264 }
0x1cf2   :  { %3769 = vsyncpa [#allocation3], 1 }

</bundles_post_ra>
